<compile_context>
chip_gen: v6e
topology: v6e:2x2x1
jax: 0.10.0
libtpu: 0.0.40
codegen_flags: <defaults>
</compile_context>

<pallas_src>
import functools

import jax
import jax.numpy as jnp
import numpy as np
from jax import lax
from jax.experimental import pallas as pl
from jax.experimental.pallas import tpu as pltpu

LANES = 128


def _round_up(x, m):
    return (x + m - 1) // m * m


def aux_head_kernel(x_ref, wc_ref, b1_ref, w2_ref, b2_ref, wl_ref, bl_ref, out_ref):
    # x_ref: (TN, Kp) bf16 — flattened NCHW tile (column = c*64 + h*8 + w, lane-padded).
    # ReLU in f32 (v5e VPU has no bf16 ALUs), cast to bf16 only for the MXU.
    x = jnp.maximum(x_ref[...].astype(jnp.float32), 0.0).astype(jnp.bfloat16)

    # Fused AvgPool(5,3) + Conv1x1 + BN1 scale: one matmul -> (TN, 512) tap-major.
    h = jnp.dot(x, wc_ref[...], preferred_element_type=jnp.float32)
    h = jnp.maximum(h + b1_ref[...], 0.0).astype(jnp.bfloat16)

    # 2x2 conv as a single (TN,512)@(512,768) matmul + folded BN2 + bias + ReLU.
    o = jnp.dot(h, w2_ref[...], preferred_element_type=jnp.float32)
    o = jnp.maximum(o + b2_ref[...], 0.0).astype(jnp.bfloat16)

    # Linear classifier; output lanes padded to a multiple of 128 (lane-dense store).
    out = jnp.dot(o, wl_ref[...], preferred_element_type=jnp.float32) + bl_ref[...]
    out_ref[...] = out.astype(out_ref.dtype)


def prepare_aux_head_params(params, eps=1e-5):
    """One-time host/XLA-side folding: BN stats, 1/25 pool divisor, pool membership,
    tap-major layouts, transposes and lane padding."""
    (w1, g1, be1, m1, v1, w2, g2, be2, m2, v2, wl, bl) = params
    c_in = w1.shape[1]
    num_classes = wl.shape[0]
    k = c_in * 64
    k_pad = _round_up(k, LANES)
    nc_pad = _round_up(num_classes, LANES)

    # Pool-window membership: mask[h*8+w, t] = 1 if (h, w) inside 5x5 window t,
    # window t = 2*i + j starts at (3*i, 3*j).  All windows lie fully inside
    # 8x8, so count_include_pad is moot and the divisor is exactly 25.
    mask = np.zeros((64, 4), np.float32)
    for i in range(2):
        for j in range(2):
            t = 2 * i + j
            for hh in range(3 * i, 3 * i + 5):
                for ww in range(3 * j, 3 * j + 5):
                    mask[hh * 8 + ww, t] = 1.0
    mask = jnp.asarray(mask)                                               # (64, 4)

    inv1 = g1 / jnp.sqrt(v1 + eps)
    b1 = (be1 - m1 * inv1).astype(jnp.float32).reshape(1, -1)              # (1, 128)
    b1t = jnp.tile(b1, (1, 4))                                             # (1, 512) tap-major
    w1s = jnp.transpose(w1[:, :, 0, 0], (1, 0)) * (inv1 / 25.0)[None, :]   # (C, 128)
    # W_comb[c*64+s, t*128+k] = mask[s, t] * w1[k, c] * inv1[k] / 25
    wc = (mask[None, :, :, None] * w1s[:, None, None, :]).reshape(k, 4 * 128)
    wc = jnp.pad(wc, ((0, k_pad - k), (0, 0))).astype(jnp.bfloat16)        # (Kp, 512)

    inv2 = g2 / jnp.sqrt(v2 + eps)
    b2 = (be2 - m2 * inv2).reshape(1, -1).astype(jnp.float32)              # (1, 768)
    w2k = jnp.transpose(w2, (2, 3, 1, 0)).reshape(4 * 128, 768)            # (512, 768) tap-major
    w2k = (w2k * inv2[None, :]).astype(jnp.bfloat16)

    wlk = jnp.transpose(wl, (1, 0))                                        # (768, NC)
    wlk = jnp.pad(wlk, ((0, 0), (0, nc_pad - num_classes))).astype(jnp.bfloat16)
    blk = jnp.pad(bl, (0, nc_pad - num_classes)).reshape(1, -1).astype(jnp.float32)

    return (wc, b1t, w2k, b2, wlk, blk)


@functools.partial(jax.jit, static_argnums=(2,))
def aux_head_forward(x_nchw, prepped, num_classes):
    wc, b1, w2k, b2, wlk, blk = prepped
    n, c, h, w = x_nchw.shape
    assert (h, w) == (8, 8), "AuxiliaryHeadCIFAR assumes 8x8 spatial input"
    k = c * h * w
    k_pad = wc.shape[0]
    nc_pad = wlk.shape[1]

    # Free, contiguous NCHW -> (N, C*64) reshape; lane-pad only (no transpose,
    # no channel-pad-to-128 of the activation).
    x = x_nchw.reshape(n, k).astype(jnp.bfloat16)
    if k_pad > k:
        x = jnp.pad(x, ((0, 0), (0, k_pad - k)))

    # Batch tile: as large as a conservative VMEM budget allows (safe for v7x's
    # 64 MiB VMEM; v5e/v6e have 128 MiB so the cap rarely binds).
    weight_bytes = 2 * (wc.size + w2k.size + wlk.size) + 4 * (b1.size + b2.size + blk.size)
    budget = 40 * 1024 * 1024
    tile_n = min(512, _round_up(n, 8))
    while tile_n > 8 and 2 * tile_n * (2 * k_pad + 4 * nc_pad) + 2 * weight_bytes > budget:
        tile_n //= 2
    n_pad = _round_up(n, tile_n)
    if n_pad > n:
        x = jnp.pad(x, ((0, n_pad - n), (0, 0)))

    # VMEM limit derived from actual block sizes (double-buffered x/out + weights).
    vmem_need = 2 * tile_n * (2 * k_pad + 4 * nc_pad) + 2 * weight_bytes + 2 * 1024 * 1024
    vmem_limit = int(min(64 * 1024 * 1024, max(vmem_need, 16 * 1024 * 1024)))

    flops = 2 * n_pad * (k_pad * 512 + 512 * 768 + 768 * nc_pad)
    bytes_accessed = (2 * n_pad * k_pad + 4 * n_pad * nc_pad + weight_bytes)

    out = pl.pallas_call(
        aux_head_kernel,
        out_shape=jax.ShapeDtypeStruct((n_pad, nc_pad), jnp.float32),
        grid=(n_pad // tile_n,),
        in_specs=[
            pl.BlockSpec((tile_n, k_pad), lambda i: (i, 0)),
            pl.BlockSpec(wc.shape, lambda i: (0, 0)),
            pl.BlockSpec(b1.shape, lambda i: (0, 0)),
            pl.BlockSpec(w2k.shape, lambda i: (0, 0)),
            pl.BlockSpec(b2.shape, lambda i: (0, 0)),
            pl.BlockSpec(wlk.shape, lambda i: (0, 0)),
            pl.BlockSpec(blk.shape, lambda i: (0, 0)),
        ],
        out_specs=pl.BlockSpec((tile_n, nc_pad), lambda i: (i, 0)),
        compiler_params=pltpu.CompilerParams(
            dimension_semantics=("parallel",),
            vmem_limit_bytes=vmem_limit),
        cost_estimate=pl.CostEstimate(
            flops=flops, transcendentals=0, bytes_accessed=bytes_accessed),
    )(x, wc, b1, w2k, b2, wlk, blk)

    return out[:n, :num_classes]


def aux_head_reference(x_nchw, params):
    """Pure-JAX (XLA) reference mirroring the PyTorch forward, eval-mode BN."""
    (w1, g1, be1, m1, v1, w2, g2, be2, m2, v2, wl, bl) = params
    eps = 1e-5

    def bn(x, g, be, m, v):
        return ((x - m[None, :, None, None])
                / jnp.sqrt(v[None, :, None, None] + eps)
                * g[None, :, None, None] + be[None, :, None, None])

    x = jnp.maximum(x_nchw, 0.0)
    x = lax.reduce_window(x, 0.0, lax.add, (1, 1, 5, 5), (1, 1, 3, 3), "VALID") / 25.0
    x = lax.conv_general_dilated(x, w1, (1, 1), "VALID",
                                 dimension_numbers=("NCHW", "OIHW", "NCHW"))
    x = jnp.maximum(bn(x, g1, be1, m1, v1), 0.0)
    x = lax.conv_general_dilated(x, w2, (1, 1), "VALID",
                                 dimension_numbers=("NCHW", "OIHW", "NCHW"))
    x = jnp.maximum(bn(x, g2, be2, m2, v2), 0.0)
    x = x.reshape(x.shape[0], -1)
    return x @ wl.T + bl


if __name__ == "__main__":
    key = jax.random.PRNGKey(0)
    N, C, num_classes = 2, 4, 10
    keys = jax.random.split(key, 13)

    x = jax.random.normal(keys[0], (N, C, 8, 8), jnp.float32)

    # Deterministic synthetic parameters (shapes per module __init__).
    w1 = 0.10 * jax.random.normal(keys[1], (128, C, 1, 1), jnp.float32)    # Conv2d(C,128,1)
    g1 = 1.0 + 0.1 * jax.random.normal(keys[2], (128,), jnp.float32)       # BN(128) gamma
    be1 = 0.1 * jax.random.normal(keys[3], (128,), jnp.float32)            # BN(128) beta
    m1 = 0.1 * jax.random.normal(keys[4], (128,), jnp.float32)             # running_mean
    v1 = jax.random.uniform(keys[5], (128,), jnp.float32, 0.5, 1.5)        # running_var
    w2 = 0.05 * jax.random.normal(keys[6], (768, 128, 2, 2), jnp.float32)  # Conv2d(128,768,2)
    g2 = 1.0 + 0.1 * jax.random.normal(keys[7], (768,), jnp.float32)
    be2 = 0.1 * jax.random.normal(keys[8], (768,), jnp.float32)
    m2 = 0.1 * jax.random.normal(keys[9], (768,), jnp.float32)
    v2 = jax.random.uniform(keys[10], (768,), jnp.float32, 0.5, 1.5)
    wl = 0.05 * jax.random.normal(keys[11], (num_classes, 768), jnp.float32)  # Linear W
    bl = 0.1 * jax.random.normal(keys[12], (num_classes,), jnp.float32)       # Linear b

    params = (w1, g1, be1, m1, v1, w2, g2, be2, m2, v2, wl, bl)

    # One-time weight folding / padding (hoisted out of the per-call path).
    prepped = jax.block_until_ready(prepare_aux_head_params(params))

    out = jax.block_until_ready(aux_head_forward(x, prepped, num_classes))
    ref = jax.block_until_ready(aux_head_reference(x, params))

    # bf16 matmul operands vs f32 XLA reference -> relaxed tolerance.
    np.testing.assert_allclose(np.asarray(out), np.asarray(ref), rtol=2e-2, atol=2e-2)
    print("KERNEL_OK")
</pallas_src>

<mosaic_0001>
module attributes {stable_mosaic.version = 11 : i64} {
  func.func @aux_head_kernel(%arg0: i32, %arg1: memref<8x256xbf16, #tpu.memory_space<vmem>>, %arg2: memref<256x512xbf16, #tpu.memory_space<vmem>>, %arg3: memref<1x512xf32, #tpu.memory_space<vmem>>, %arg4: memref<512x768xbf16, #tpu.memory_space<vmem>>, %arg5: memref<1x768xf32, #tpu.memory_space<vmem>>, %arg6: memref<768x128xbf16, #tpu.memory_space<vmem>>, %arg7: memref<1x128xf32, #tpu.memory_space<vmem>>, %arg8: memref<8x128xf32, #tpu.memory_space<vmem>>) attributes {dimension_semantics = [#tpu.dimension_semantics<parallel>], iteration_bounds = array<i64: 1>, scalar_prefetch = 0 : i64, scratch_operands = 0 : i64, tpu.core_type = #tpu.core_type<tc>, window_params = [{transform_indices = @transform_0, window_bounds = array<i64: 8, 256>}, {pipeline_mode = #tpu.pipeline_mode<synchronous>, transform_indices = @transform_1, window_bounds = array<i64: 256, 512>}, {pipeline_mode = #tpu.pipeline_mode<synchronous>, transform_indices = @transform_2, window_bounds = array<i64: 1, 512>}, {pipeline_mode = #tpu.pipeline_mode<synchronous>, transform_indices = @transform_3, window_bounds = array<i64: 512, 768>}, {pipeline_mode = #tpu.pipeline_mode<synchronous>, transform_indices = @transform_4, window_bounds = array<i64: 1, 768>}, {pipeline_mode = #tpu.pipeline_mode<synchronous>, transform_indices = @transform_5, window_bounds = array<i64: 768, 128>}, {pipeline_mode = #tpu.pipeline_mode<synchronous>, transform_indices = @transform_6, window_bounds = array<i64: 1, 128>}, {transform_indices = @transform_7, window_bounds = array<i64: 8, 128>}]} {
    %c0 = arith.constant 0 : index
    %c0_0 = arith.constant 0 : index
    %0 = vector.load %arg1[%c0, %c0_0] : memref<8x256xbf16, #tpu.memory_space<vmem>>, vector<8x256xbf16>
    %1 = arith.extf %0 : vector<8x256xbf16> to vector<8x256xf32>
    %cst = arith.constant 0.000000e+00 : f32
    %2 = vector.broadcast %cst : f32 to vector<8x256xf32>
    %3 = arith.maximumf %1, %2 : vector<8x256xf32>
    %4 = arith.truncf %3 : vector<8x256xf32> to vector<8x256xbf16>
    %c0_1 = arith.constant 0 : index
    %c0_2 = arith.constant 0 : index
    %5 = vector.load %arg2[%c0_1, %c0_2] : memref<256x512xbf16, #tpu.memory_space<vmem>>, vector<256x512xbf16>
    %cst_3 = arith.constant dense<0.000000e+00> : vector<8x512xf32>
    %6 = tpu.matmul %4, %5, %cst_3 {dimension_numbers = #tpu.dot_dimension_numbers<[1], [0], [0], [1], [0, 0, 1, 1], [], []>} : vector<8x256xbf16>, vector<256x512xbf16>, vector<8x512xf32> -> vector<8x512xf32>
    %c0_4 = arith.constant 0 : index
    %c0_5 = arith.constant 0 : index
    %7 = vector.load %arg3[%c0_4, %c0_5] : memref<1x512xf32, #tpu.memory_space<vmem>>, vector<1x512xf32>
    %8 = vector.broadcast %7 : vector<1x512xf32> to vector<8x512xf32>
    %9 = arith.addf %6, %8 : vector<8x512xf32>
    %cst_6 = arith.constant 0.000000e+00 : f32
    %10 = vector.broadcast %cst_6 : f32 to vector<8x512xf32>
    %11 = arith.maximumf %9, %10 : vector<8x512xf32>
    %12 = arith.truncf %11 : vector<8x512xf32> to vector<8x512xbf16>
    %c0_7 = arith.constant 0 : index
    %c0_8 = arith.constant 0 : index
    %13 = vector.load %arg4[%c0_7, %c0_8] : memref<512x768xbf16, #tpu.memory_space<vmem>>, vector<512x768xbf16>
    %cst_9 = arith.constant dense<0.000000e+00> : vector<8x768xf32>
    %14 = tpu.matmul %12, %13, %cst_9 {dimension_numbers = #tpu.dot_dimension_numbers<[1], [0], [0], [1], [0, 0, 1, 1], [], []>} : vector<8x512xbf16>, vector<512x768xbf16>, vector<8x768xf32> -> vector<8x768xf32>
    %c0_10 = arith.constant 0 : index
    %c0_11 = arith.constant 0 : index
    %15 = vector.load %arg5[%c0_10, %c0_11] : memref<1x768xf32, #tpu.memory_space<vmem>>, vector<1x768xf32>
    %16 = vector.broadcast %15 : vector<1x768xf32> to vector<8x768xf32>
    %17 = arith.addf %14, %16 : vector<8x768xf32>
    %cst_12 = arith.constant 0.000000e+00 : f32
    %18 = vector.broadcast %cst_12 : f32 to vector<8x768xf32>
    %19 = arith.maximumf %17, %18 : vector<8x768xf32>
    %20 = arith.truncf %19 : vector<8x768xf32> to vector<8x768xbf16>
    %c0_13 = arith.constant 0 : index
    %c0_14 = arith.constant 0 : index
    %21 = vector.load %arg6[%c0_13, %c0_14] : memref<768x128xbf16, #tpu.memory_space<vmem>>, vector<768x128xbf16>
    %cst_15 = arith.constant dense<0.000000e+00> : vector<8x128xf32>
    %22 = tpu.matmul %20, %21, %cst_15 {dimension_numbers = #tpu.dot_dimension_numbers<[1], [0], [0], [1], [0, 0, 1, 1], [], []>} : vector<8x768xbf16>, vector<768x128xbf16>, vector<8x128xf32> -> vector<8x128xf32>
    %c0_16 = arith.constant 0 : index
    %c0_17 = arith.constant 0 : index
    %23 = vector.load %arg7[%c0_16, %c0_17] : memref<1x128xf32, #tpu.memory_space<vmem>>, vector<1x128xf32>
    %24 = vector.broadcast %23 : vector<1x128xf32> to vector<8x128xf32>
    %25 = arith.addf %22, %24 : vector<8x128xf32>
    %c0_18 = arith.constant 0 : index
    %c0_19 = arith.constant 0 : index
    %26 = vector.load %arg8[%c0_18, %c0_19] : memref<8x128xf32, #tpu.memory_space<vmem>>, vector<8x128xf32>
    tpu.vector_store %arg8[%c0_18, %c0_19], %25 {strides = array<i32>} : memref<8x128xf32, #tpu.memory_space<vmem>>, vector<8x128xf32>,
    return
  }
  func.func @transform_0(%arg0: i32) -> (i32, i32) {
    %c0_i32 = arith.constant 0 : i32
    %c0_i32_0 = arith.constant 0 : i32
    return %arg0, %c0_i32 : i32, i32
  }
  func.func @transform_1(%arg0: i32) -> (i32, i32) {
    %c0_i32 = arith.constant 0 : i32
    %c0_i32_0 = arith.constant 0 : i32
    %c0_i32_1 = arith.constant 0 : i32
    return %c0_i32, %c0_i32_0 : i32, i32
  }
  func.func @transform_2(%arg0: i32) -> (i32, i32) {
    %c0_i32 = arith.constant 0 : i32
    %c0_i32_0 = arith.constant 0 : i32
    %c0_i32_1 = arith.constant 0 : i32
    return %c0_i32, %c0_i32_0 : i32, i32
  }
  func.func @transform_3(%arg0: i32) -> (i32, i32) {
    %c0_i32 = arith.constant 0 : i32
    %c0_i32_0 = arith.constant 0 : i32
    %c0_i32_1 = arith.constant 0 : i32
    return %c0_i32, %c0_i32_0 : i32, i32
  }
  func.func @transform_4(%arg0: i32) -> (i32, i32) {
    %c0_i32 = arith.constant 0 : i32
    %c0_i32_0 = arith.constant 0 : i32
    %c0_i32_1 = arith.constant 0 : i32
    return %c0_i32, %c0_i32_0 : i32, i32
  }
  func.func @transform_5(%arg0: i32) -> (i32, i32) {
    %c0_i32 = arith.constant 0 : i32
    %c0_i32_0 = arith.constant 0 : i32
    %c0_i32_1 = arith.constant 0 : i32
    return %c0_i32, %c0_i32_0 : i32, i32
  }
  func.func @transform_6(%arg0: i32) -> (i32, i32) {
    %c0_i32 = arith.constant 0 : i32
    %c0_i32_0 = arith.constant 0 : i32
    %c0_i32_1 = arith.constant 0 : i32
    return %c0_i32, %c0_i32_0 : i32, i32
  }
  func.func @transform_7(%arg0: i32) -> (i32, i32) {
    %c0_i32 = arith.constant 0 : i32
    %c0_i32_0 = arith.constant 0 : i32
    return %arg0, %c0_i32 : i32, i32
  }
}

</mosaic_0001>

<bundles_post_ra>
// kernel: aux_head_forward.1
= control target key start
LH: loop header
LB: loop body
LE: loop exit
PB: predicated region body
PF: predicated region fallthrough
CT: control target
= control target key end

     0   :  { %12 = vsyncpa [#allocation3], 0  ;;  %s3532_s0 = inlined_call_operand.vmem [shape: bf16[8,256], index: 0, kind: input, shape index: {}]   ;;  %s3533_s1 = inlined_call_operand.hbm [shape: bf16[256,512], index: 1, kind: input, shape index: {}]   ;;  %s3534_s2 = inlined_call_operand.vmem [shape: f32[1,512], index: 2, kind: input, shape index: {}]   ;;  %s3535_s3 = inlined_call_operand.hbm [shape: bf16[512,768], index: 3, kind: input, shape index: {}]   ;;  %s3536_s4 = inlined_call_operand.vmem [shape: f32[1,768], index: 4, kind: input, shape index: {}]   ;;  %s3537_s5 = inlined_call_operand.hbm [shape: bf16[768,128], index: 5, kind: input, shape index: {}]   ;;  %s3538_s6 = inlined_call_operand.vmem [shape: f32[1,128], index: 6, kind: input, shape index: {}]   ;;  %s3539_s7 = inlined_call_operand.vmem [shape: f32[8,128], index: 7, kind: output, shape index: {}]  }
   0x1   :  { %13 = vsyncpa [#allocation5], 0  ;;  %s3407_s24 = smov [#allocation4]  }
   0x2   :  { %s35_s25 = sshll.u32 %s3407_s24, 4  ;;  %s36_s25 = int_to_ptr.vmem [resolvable:$true] %s35_s25 }
   0x3   :  { %s3351_s26 = scalar_lea.vmem %s36_s25, 24576  ;;  %p3356_p1 = scmp.lt.s32.totalorder %s36_s25, %s36_s25 }
   0x4   :  { %p3352_p0 = scmp.ne.s32.totalorder %s36_s25, %s3351_s26  ;;  %p3357_p2 = scmp.lt.s32.totalorder %s3351_s26, %s3351_s26 }
   0x6   :  { %p3358_p3 = por %p3357_p2, %p3356_p1 }
   0x8   :  { %p3359_p4 = pnand %p3358_p3, %p3352_p0 }
   0xa   :  { %3362 = shalt.err (!%p3359_p4)
}
   0xb   :  { %s3408_s27 = smov 384   ;;  %s3409_s28 = smov 24  }
   0xc   :  { %41 = dma.hbm_to_vmem [thread:$0]  %s3535_s3, 24576, %s36_s25, [#allocation5], %s3408_s27, %s3408_s27, %s3409_s28  }
   0xd   :  { %s3410_s8 = smov [#allocation2]  }
   0xe   :  { %s21_s9 = sshll.u32 %s3410_s8, 4  ;;  %s22_s9 = int_to_ptr.vmem [resolvable:$true] %s21_s9 }
   0xf   :  { %s3371_s10 = scalar_lea.vmem %s22_s9, 8192  ;;  %p3376_p6 = scmp.lt.s32.totalorder %s22_s9, %s22_s9 }
  0x10   :  { %p3372_p5 = scmp.ne.s32.totalorder %s22_s9, %s3371_s10  ;;  %p3377_p7 = scmp.lt.s32.totalorder %s3371_s10, %s3371_s10 }
  0x12   :  { %p3378_p8 = por %p3377_p7, %p3376_p6 }
  0x14   :  { %p3379_p9 = pnand %p3378_p8, %p3372_p5 }
  0x16   :  { %3382 = shalt.err (!%p3379_p9)
}
  0x17   :  { %s3411_s11 = smov 256   ;;  %s3412_s12 = smov 16  }
  0x18   :  { %27 = dma.hbm_to_vmem [thread:$0]  %s3533_s1, 8192, %s22_s9, [#allocation3], %s3411_s11, %s3411_s11, %s3412_s12  }
  0x19   :  { %s3413_s15 = smov [#allocation6]  }
  0x1a   :  { %s49_s16 = sshll.u32 %s3413_s15, 4  ;;  %s50_s16 = int_to_ptr.vmem [resolvable:$true] %s49_s16 }
  0x1b   :  { %s3391_s3 = scalar_lea.vmem %s50_s16, 6144  ;;  %p3396_p11 = scmp.lt.s32.totalorder %s50_s16, %s50_s16 }
  0x1c   :  { %p3392_p10 = scmp.ne.s32.totalorder %s50_s16, %s3391_s3  ;;  %p3397_p12 = scmp.lt.s32.totalorder %s3391_s3, %s3391_s3 }
  0x1e   :  { %p3398_p13 = por %p3397_p12, %p3396_p11 }
  0x20   :  { %p3399_p0 = pnand %p3398_p13, %p3392_p10 }
  0x22   :  { %3402 = shalt.err (!%p3399_p0)
}
  0x23   :  { %s3414_s17 = smov 64   ;;  %s3415_s18 = smov 4  }
  0x24   :  { %55 = dma.hbm_to_vmem [thread:$0]  %s3537_s5, 6144, %s50_s16, [#allocation5], %s3414_s17, %s3414_s17, %s3415_s18  }
  0x25   :  { %3403 = dma.done.wait [#allocation3], 8192  }
  0x26   :  { %3404 = vsyncadd [#allocation3], 4294959104 }
  0x27   :  { %3405 = dma.done.wait [#allocation5], 30720  }
  0x28   :  { %3406 = vsyncadd [#allocation5], 4294936576  ;;  %v2911_v0 = vld [vmem:[#allocation2 + $0xe4] ss:$16 sps:$4 sm:$0xff]   ;;  %v2913_v1 = vld [vmem:[#allocation2 + $0xec] ss:$16 sps:$4 sm:$0xff]  }
  0x29   :  { %481 = vmatprep.subr.bf16.mxu0 %v2911_v0  ;;  %v2915_v2 = vld [vmem:[#allocation2 + $0xe0] ss:$16 sps:$4 sm:$0xff]   ;;  %v2916_v3 = vld [vmem:[#allocation2 + $0xe8] ss:$16 sps:$4 sm:$0xff]   ;;  %522 = vmatprep.subr.bf16.mxu1 %v2913_v1  ;;  %v2917_v4 = vld [vmem:[#allocation2 + $0xc4] ss:$16 sps:$4 sm:$0xff]  }
  0x2a   :  { %482 = vmatpush1.bf16.msra.mxu0 %v2915_v2  ;;  %523 = vmatpush1.bf16.msra.mxu1 %v2916_v3  ;;  %v2919_v5 = vld [vmem:[#allocation2 + $0xcc] ss:$16 sps:$4 sm:$0xff]   ;;  %v2921_v6 = vld [vmem:[#allocation2 + $0xc0] ss:$16 sps:$4 sm:$0xff]   ;;  %v2922_v7 = vld [vmem:[#allocation2 + $0xc8] ss:$16 sps:$4 sm:$0xff]  }
  0x2b   :  { %483 = vmatprep.subr.bf16.mxu0 %v2917_v4  ;;  %524 = vmatprep.subr.bf16.mxu1 %v2919_v5  ;;  %v2923_v8 = vld [vmem:[#allocation2 + $0xa4] ss:$16 sps:$4 sm:$0xff]   ;;  %v2925_v9 = vld [vmem:[#allocation2 + $0xac] ss:$16 sps:$4 sm:$0xff]   ;;  %v2927_v10 = vld [vmem:[#allocation2 + $0xa0] ss:$16 sps:$4 sm:$0xff]  }
  0x2c   :  { %v2928_v11 = vld [vmem:[#allocation2 + $0xa8] ss:$16 sps:$4 sm:$0xff]   ;;  %v2929_v12 = vld [vmem:[#allocation2 + $0x84] ss:$16 sps:$4 sm:$0xff]   ;;  %v2931_v13 = vld [vmem:[#allocation2 + $0x8c] ss:$16 sps:$4 sm:$0xff]  }
  0x2d   :  { %v2933_v14 = vld [vmem:[#allocation2 + $0x80] ss:$16 sps:$4 sm:$0xff]   ;;  %v2934_v15 = vld [vmem:[#allocation2 + $0x88] ss:$16 sps:$4 sm:$0xff]   ;;  %v2935_v16 = vld [vmem:[#allocation2 + $0x64] ss:$16 sps:$4 sm:$0xff]  }
  0x2e   :  { %484 = vmatpush1.bf16.msra.mxu0 %v2921_v6  ;;  %525 = vmatpush1.bf16.msra.mxu1 %v2922_v7  ;;  %v2937_v17 = vld [vmem:[#allocation2 + $0x6c] ss:$16 sps:$4 sm:$0xff]   ;;  %v2939_v18 = vld [vmem:[#allocation2 + $0x60] ss:$16 sps:$4 sm:$0xff]   ;;  %v2940_v19 = vld [vmem:[#allocation2 + $0x68] ss:$16 sps:$4 sm:$0xff]  }
  0x2f   :  { %485 = vmatprep.subr.bf16.mxu0 %v2923_v8  ;;  %526 = vmatprep.subr.bf16.mxu1 %v2925_v9  ;;  %v2941_v20 = vld [vmem:[#allocation2 + $0x44] ss:$16 sps:$4 sm:$0xff]   ;;  %v2943_v21 = vld [vmem:[#allocation2 + $0x4c] ss:$16 sps:$4 sm:$0xff]   ;;  %v2945_v22 = vld [vmem:[#allocation2 + $0x40] ss:$16 sps:$4 sm:$0xff]  }
  0x30   :  { %v2946_v23 = vld [vmem:[#allocation2 + $0x48] ss:$16 sps:$4 sm:$0xff]   ;;  %v2947_v24 = vld [vmem:[#allocation2 + $0x24] ss:$16 sps:$4 sm:$0xff]   ;;  %v2949_v25 = vld [vmem:[#allocation2 + $0x2c] ss:$16 sps:$4 sm:$0xff]  }
  0x31   :  { %v2951_v26 = vld [vmem:[#allocation2 + $0x20] ss:$16 sps:$4 sm:$0xff]   ;;  %v2952_v27 = vld [vmem:[#allocation2 + $0x28] ss:$16 sps:$4 sm:$0xff]   ;;  %v2953_v28 = vld [vmem:[#allocation2 + $0x4] ss:$16 sps:$4 sm:$0xff]  }
  0x32   :  { %486 = vmatpush1.bf16.msra.mxu0 %v2927_v10  ;;  %527 = vmatpush1.bf16.msra.mxu1 %v2928_v11  ;;  %v2955_v29 = vld [vmem:[#allocation2 + $0xc] ss:$16 sps:$4 sm:$0xff]   ;;  %v2957_v30 = vld [vmem:[#allocation2] ss:$16 sps:$4 sm:$0xff]   ;;  %v2958_v31 = vld [vmem:[#allocation2 + $0x8] ss:$16 sps:$4 sm:$0xff]  }
  0x33   :  { %487 = vmatprep.subr.bf16.mxu0 %v2929_v12  ;;  %528 = vmatprep.subr.bf16.mxu1 %v2931_v13  ;;  %v2959_v32 = vld [vmem:[#allocation2 + $0x1e4] ss:$16 sps:$4 sm:$0xff]   ;;  %v2961_v33 = vld [vmem:[#allocation2 + $0x1ec] ss:$16 sps:$4 sm:$0xff]   ;;  %v2963_v34 = vld [vmem:[#allocation2 + $0x1e0] ss:$16 sps:$4 sm:$0xff]  }
  0x34   :  { %v2964_v35 = vld [vmem:[#allocation2 + $0x1e8] ss:$16 sps:$4 sm:$0xff]   ;;  %v2965_v36 = vld [vmem:[#allocation2 + $0x1c4] ss:$16 sps:$4 sm:$0xff]   ;;  %v2967_v37 = vld [vmem:[#allocation2 + $0x1cc] ss:$16 sps:$4 sm:$0xff]  }
  0x35   :  { %v2969_v38 = vld [vmem:[#allocation2 + $0x1c0] ss:$16 sps:$4 sm:$0xff]   ;;  %v2970_v39 = vld [vmem:[#allocation2 + $0x1c8] ss:$16 sps:$4 sm:$0xff]   ;;  %v2971_v40 = vld [vmem:[#allocation2 + $0x1a4] ss:$16 sps:$4 sm:$0xff]  }
  0x36   :  { %488 = vmatpush1.bf16.msra.mxu0 %v2933_v14  ;;  %529 = vmatpush1.bf16.msra.mxu1 %v2934_v15  ;;  %v2973_v41 = vld [vmem:[#allocation2 + $0x1ac] ss:$16 sps:$4 sm:$0xff]   ;;  %v2975_v42 = vld [vmem:[#allocation2 + $0x1a0] ss:$16 sps:$4 sm:$0xff]   ;;  %v2976_v43 = vld [vmem:[#allocation2 + $0x1a8] ss:$16 sps:$4 sm:$0xff]  }
  0x37   :  { %489 = vmatprep.subr.bf16.mxu0 %v2935_v16  ;;  %530 = vmatprep.subr.bf16.mxu1 %v2937_v17  ;;  %v2977_v44 = vld [vmem:[#allocation2 + $0x184] ss:$16 sps:$4 sm:$0xff]   ;;  %v2979_v45 = vld [vmem:[#allocation2 + $0x18c] ss:$16 sps:$4 sm:$0xff]   ;;  %v2981_v47 = vld [vmem:[#allocation2 + $0x180] ss:$16 sps:$4 sm:$0xff]  }
  0x38   :  { %v68_v46 = vld [vmem:[%s3532_s0] sm:$0xff]  ;;  %v2982_v49 = vld [vmem:[#allocation2 + $0x188] ss:$16 sps:$4 sm:$0xff]   ;;  %v2985_v51 = vld [vmem:[#allocation2 + $0x16c] ss:$16 sps:$4 sm:$0xff]  }
  0x39   :  { %v70_v48 = vunpack.c.h.bf16 %v68_v46  ;;  %v2983_v50 = vld [vmem:[#allocation2 + $0x164] ss:$16 sps:$4 sm:$0xff]   ;;  %v2987_v54 = vld [vmem:[#allocation2 + $0x160] ss:$16 sps:$4 sm:$0xff]   ;;  %v2988_v55 = vld [vmem:[#allocation2 + $0x168] ss:$16 sps:$4 sm:$0xff]   ;;  %v69_v62 = vunpack.c.l.bf16 %v68_v46 }
  0x3a   :  { %490 = vmatpush1.bf16.msra.mxu0 %v2939_v18  ;;  %531 = vmatpush1.bf16.msra.mxu1 %v2940_v19  ;;  %v2989_v56 = vld [vmem:[#allocation2 + $0x144] ss:$16 sps:$4 sm:$0xff]   ;;  %v2991_v57 = vld [vmem:[#allocation2 + $0x14c] ss:$16 sps:$4 sm:$0xff]   ;;  %v2993_v58 = vld [vmem:[#allocation2 + $0x140] ss:$16 sps:$4 sm:$0xff]  }
  0x3b   :  { %491 = vmatprep.subr.bf16.mxu0 %v2941_v20  ;;  %532 = vmatprep.subr.bf16.mxu1 %v2943_v21  ;;  %v72_v52 = vmax.f32 %v70_v48, 0.0  ;;  %v2994_v59 = vld [vmem:[#allocation2 + $0x148] ss:$16 sps:$4 sm:$0xff]   ;;  %v2995_v60 = vld [vmem:[#allocation2 + $0x124] ss:$16 sps:$4 sm:$0xff]   ;;  %v71_v3 = vmax.f32 %v69_v62, 0.0 }
  0x3c   :  { %v2997_v61 = vld [vmem:[#allocation2 + $0x12c] ss:$16 sps:$4 sm:$0xff]   ;;  %v2999_v63 = vld [vmem:[#allocation2 + $0x120] ss:$16 sps:$4 sm:$0xff]   ;;  %v3000_v0 = vld [vmem:[#allocation2 + $0x128] ss:$16 sps:$4 sm:$0xff]  }
  0x3d   :  { %v74_v53 = vpack.c.bf16 %v72_v52, %v72_v52  ;;  %v3001_v1 = vld [vmem:[#allocation2 + $0x104] ss:$16 sps:$4 sm:$0xff]   ;;  %v3003_v2 = vld [vmem:[#allocation2 + $0x10c] ss:$16 sps:$4 sm:$0xff]   ;;  %v3005_v4 = vld [vmem:[#allocation2 + $0x100] ss:$16 sps:$4 sm:$0xff]   ;;  %v73_v8 = vpack.c.bf16 %v71_v3, %v71_v3 }
  0x3e   :  { %492 = vmatpush1.bf16.msra.mxu0 %v2945_v22  ;;  %533 = vmatpush1.bf16.msra.mxu1 %v2946_v23  ;;  %v3006_v5 = vld [vmem:[#allocation2 + $0x108] ss:$16 sps:$4 sm:$0xff]   ;;  %v3009_v6 = vld [vmem:[#allocation4 + $0x154] ss:$24 sps:$4 sm:$0xff]   ;;  %v3015_v11 = vld [vmem:[#allocation4 + $0x124] ss:$24 sps:$4 sm:$0xff]  }
  0x3f   :  { %493 = vmatprep.subr.bf16.mxu0 %v2947_v24  ;;  %534 = vmatprep.subr.bf16.mxu1 %v2949_v25  ;;  %v3012_v7 = vld [vmem:[#allocation4 + $0x454] ss:$24 sps:$4 sm:$0xff]   ;;  %v3007_v9 = vld [vmem:[#allocation4 + $0x150] ss:$24 sps:$4 sm:$0xff]   ;;  %v3018_v12 = vld [vmem:[#allocation4 + $0x424] ss:$24 sps:$4 sm:$0xff]  }
  0x40   :  { %513 = vmatprep.mubr.bf16.mxu0 %v74_v53  ;;  %554 = vmatprep.mubr.bf16.mxu1 %v74_v53  ;;  %v3010_v10 = vld [vmem:[#allocation4 + $0x450] ss:$24 sps:$4 sm:$0xff]   ;;  %v3013_v13 = vld [vmem:[#allocation4 + $0x120] ss:$24 sps:$4 sm:$0xff]   ;;  %v3021_v15 = vld [vmem:[#allocation4 + $0xf4] ss:$24 sps:$4 sm:$0xff]  }
  0x41   :  { %v3016_v14 = vld [vmem:[#allocation4 + $0x420] ss:$24 sps:$4 sm:$0xff]   ;;  %v3024_v16 = vld [vmem:[#allocation4 + $0x3f4] ss:$24 sps:$4 sm:$0xff]   ;;  %v3019_v17 = vld [vmem:[#allocation4 + $0xf0] ss:$24 sps:$4 sm:$0xff]  }
  0x42   :  { %494 = vmatpush1.bf16.msra.mxu0 %v2951_v26  ;;  %535 = vmatpush1.bf16.msra.mxu1 %v2952_v27  ;;  %v3022_v18 = vld [vmem:[#allocation4 + $0x3f0] ss:$24 sps:$4 sm:$0xff]   ;;  %v3027_v19 = vld [vmem:[#allocation4 + $0xc4] ss:$24 sps:$4 sm:$0xff]   ;;  %v3025_v21 = vld [vmem:[#allocation4 + $0xc0] ss:$24 sps:$4 sm:$0xff]  }
  0x43   :  { %495 = vmatprep.subr.bf16.mxu0 %v2953_v28  ;;  %536 = vmatprep.subr.bf16.mxu1 %v2955_v29  ;;  %v3030_v20 = vld [vmem:[#allocation4 + $0x3c4] ss:$24 sps:$4 sm:$0xff]   ;;  %v3028_v22 = vld [vmem:[#allocation4 + $0x3c0] ss:$24 sps:$4 sm:$0xff]   ;;  %v3033_v23 = vld [vmem:[#allocation4 + $0x94] ss:$24 sps:$4 sm:$0xff]  }
  0x44   :  { %v3036_v24 = vld [vmem:[#allocation4 + $0x394] ss:$24 sps:$4 sm:$0xff]   ;;  %v3031_v25 = vld [vmem:[#allocation4 + $0x90] ss:$24 sps:$4 sm:$0xff]   ;;  %v3039_v27 = vld [vmem:[#allocation4 + $0x64] ss:$24 sps:$4 sm:$0xff]  }
  0x45   :  { %v3034_v26 = vld [vmem:[#allocation4 + $0x390] ss:$24 sps:$4 sm:$0xff]   ;;  %v3042_v28 = vld [vmem:[#allocation4 + $0x364] ss:$24 sps:$4 sm:$0xff]   ;;  %v3037_v29 = vld [vmem:[#allocation4 + $0x60] ss:$24 sps:$4 sm:$0xff]  }
  0x46   :  { %496 = vmatpush1.bf16.msra.mxu0 %v2957_v30  ;;  %537 = vmatpush1.bf16.msra.mxu1 %v2958_v31  ;;  %v3040_v30 = vld [vmem:[#allocation4 + $0x360] ss:$24 sps:$4 sm:$0xff]   ;;  %v3045_v31 = vld [vmem:[#allocation4 + $0x34] ss:$24 sps:$4 sm:$0xff]   ;;  %v3078_v52 = vld [vmem:[#allocation4 + $0x544] ss:$24 sps:$4 sm:$0xff]  }
  0x47   :  { %497 = vmatprep.subr.bf16.mxu0 %v2959_v32  ;;  %538 = vmatprep.subr.bf16.mxu1 %v2961_v33  ;;  %v3048_v32 = vld [vmem:[#allocation4 + $0x334] ss:$24 sps:$4 sm:$0xff]   ;;  %v3043_v33 = vld [vmem:[#allocation4 + $0x30] ss:$24 sps:$4 sm:$0xff]   ;;  %v3064_v46 = vld [vmem:[#allocation4 + $0x5a0] ss:$24 sps:$4 sm:$0xff]  }
  0x48   :  { %v3072_v48 = vld [vmem:[#allocation4 + $0x574] ss:$24 sps:$4 sm:$0xff]   ;;  %v3073_v53 = vld [vmem:[#allocation4 + $0x240] ss:$24 sps:$4 sm:$0xff]   ;;  %v3099_v3 = vld [vmem:[#allocation4 + $0x184] ss:$24 sps:$4 sm:$0xff]  }
  0x49   :  { %v3088_v62 = vld [vmem:[#allocation4 + $0x4e0] ss:$24 sps:$4 sm:$0xff]  }
  0x4a   :  { %498 = vmatpush2.bf16.msra.mxu0 %v2963_v34  ;;  %539 = vmatpush2.bf16.msra.mxu1 %v2964_v35  ;;  %v3046_v34 = vld [vmem:[#allocation4 + $0x330] ss:$24 sps:$4 sm:$0xff]   ;;  %v3051_v35 = vld [vmem:[#allocation4 + $0x4] ss:$24 sps:$4 sm:$0xff]  }
  0x4b   :  { %499 = vmatprep.subr.bf16.mxu0 %v2965_v36  ;;  %540 = vmatprep.subr.bf16.mxu1 %v2967_v37  ;;  %v3054_v36 = vld [vmem:[#allocation4 + $0x304] ss:$24 sps:$4 sm:$0xff]   ;;  %v3049_v37 = vld [vmem:[#allocation4] ss:$24 sps:$4 sm:$0xff]  }
  0x4e   :  { %500 = vmatpush2.bf16.msra.mxu0 %v2969_v38  ;;  %541 = vmatpush2.bf16.msra.mxu1 %v2970_v39  ;;  %v3052_v38 = vld [vmem:[#allocation4 + $0x300] ss:$24 sps:$4 sm:$0xff]   ;;  %v3057_v39 = vld [vmem:[#allocation4 + $0x2d4] ss:$24 sps:$4 sm:$0xff]  }
  0x4f   :  { %501 = vmatprep.subr.bf16.mxu0 %v2971_v40  ;;  %542 = vmatprep.subr.bf16.mxu1 %v2973_v41  ;;  %v3060_v40 = vld [vmem:[#allocation4 + $0x5d4] ss:$24 sps:$4 sm:$0xff]   ;;  %v3055_v41 = vld [vmem:[#allocation4 + $0x2d0] ss:$24 sps:$4 sm:$0xff]  }
  0x52   :  { %502 = vmatpush2.bf16.msra.mxu0 %v2975_v42  ;;  %543 = vmatpush2.bf16.msra.mxu1 %v2976_v43  ;;  %v3058_v42 = vld [vmem:[#allocation4 + $0x5d0] ss:$24 sps:$4 sm:$0xff]   ;;  %v3063_v43 = vld [vmem:[#allocation4 + $0x2a4] ss:$24 sps:$4 sm:$0xff]  }
  0x53   :  { %503 = vmatprep.subr.bf16.mxu0 %v2977_v44  ;;  %544 = vmatprep.subr.bf16.mxu1 %v2979_v45  ;;  %v3066_v44 = vld [vmem:[#allocation4 + $0x5a4] ss:$24 sps:$4 sm:$0xff]   ;;  %v3061_v45 = vld [vmem:[#allocation4 + $0x2a0] ss:$24 sps:$4 sm:$0xff]  }
  0x56   :  { %504 = vmatpush2.bf16.msra.mxu0 %v2981_v47  ;;  %545 = vmatpush2.bf16.msra.mxu1 %v2982_v49  ;;  %v3069_v47 = vld [vmem:[#allocation4 + $0x274] ss:$24 sps:$4 sm:$0xff]   ;;  %v3067_v49 = vld [vmem:[#allocation4 + $0x270] ss:$24 sps:$4 sm:$0xff]  }
  0x57   :  { %505 = vmatprep.subr.bf16.mxu0 %v2983_v50  ;;  %546 = vmatprep.subr.bf16.mxu1 %v2985_v51  ;;  %v3070_v50 = vld [vmem:[#allocation4 + $0x570] ss:$24 sps:$4 sm:$0xff]   ;;  %v3075_v51 = vld [vmem:[#allocation4 + $0x244] ss:$24 sps:$4 sm:$0xff]  }
  0x5a   :  { %506 = vmatpush2.bf16.msra.mxu0 %v2987_v54  ;;  %547 = vmatpush2.bf16.msra.mxu1 %v2988_v55  ;;  %v3076_v54 = vld [vmem:[#allocation4 + $0x540] ss:$24 sps:$4 sm:$0xff]   ;;  %v3081_v55 = vld [vmem:[#allocation4 + $0x214] ss:$24 sps:$4 sm:$0xff]  }
  0x5b   :  { %507 = vmatprep.subr.bf16.mxu0 %v2989_v56  ;;  %548 = vmatprep.subr.bf16.mxu1 %v2991_v57  ;;  %v3084_v56 = vld [vmem:[#allocation4 + $0x514] ss:$24 sps:$4 sm:$0xff]   ;;  %v3079_v57 = vld [vmem:[#allocation4 + $0x210] ss:$24 sps:$4 sm:$0xff]  }
  0x5e   :  { %508 = vmatpush2.bf16.msra.mxu0 %v2993_v58  ;;  %549 = vmatpush2.bf16.msra.mxu1 %v2994_v59  ;;  %v3082_v58 = vld [vmem:[#allocation4 + $0x510] ss:$24 sps:$4 sm:$0xff]   ;;  %v3087_v59 = vld [vmem:[#allocation4 + $0x1e4] ss:$24 sps:$4 sm:$0xff]  }
  0x5f   :  { %509 = vmatprep.subr.bf16.mxu0 %v2995_v60  ;;  %550 = vmatprep.subr.bf16.mxu1 %v2997_v61  ;;  %v3090_v60 = vld [vmem:[#allocation4 + $0x4e4] ss:$24 sps:$4 sm:$0xff]   ;;  %v3085_v61 = vld [vmem:[#allocation4 + $0x1e0] ss:$24 sps:$4 sm:$0xff]  }
  0x62   :  { %510 = vmatpush2.bf16.msra.mxu0 %v2999_v63  ;;  %551 = vmatpush2.bf16.msra.mxu1 %v3000_v0  ;;  %v3093_v63 = vld [vmem:[#allocation4 + $0x1b4] ss:$24 sps:$4 sm:$0xff]  }
  0x63   :  { %511 = vmatprep.subr.bf16.mxu0 %v3001_v1  ;;  %552 = vmatprep.subr.bf16.mxu1 %v3003_v2  ;;  %v3096_v0 = vld [vmem:[#allocation4 + $0x4b4] ss:$24 sps:$4 sm:$0xff]   ;;  %v3091_v1 = vld [vmem:[#allocation4 + $0x1b0] ss:$24 sps:$4 sm:$0xff]  }
  0x64   :  { %v3094_v2 = vld [vmem:[#allocation4 + $0x4b0] ss:$24 sps:$4 sm:$0xff]  }
  0x66   :  { %512 = vmatpush2.bf16.msra.mxu0 %v3005_v4  ;;  %553 = vmatpush2.bf16.msra.mxu1 %v3006_v5  ;;  %v3102_v4 = vld [vmem:[#allocation4 + $0x484] ss:$24 sps:$4 sm:$0xff]   ;;  %v3097_v5 = vld [vmem:[#allocation4 + $0x180] ss:$24 sps:$4 sm:$0xff]  }
  0x67   :  { %1755 = vmatprep.subr.bf16.mxu0 %v3009_v6  ;;  %1796 = vmatprep.subr.bf16.mxu1 %v3012_v7  ;;  %v3100_v6 = vld [vmem:[#allocation4 + $0x480] ss:$24 sps:$4 sm:$0xff]   ;;  %v3105_v7 = vld [vmem:[#allocation4 + $0x15c] ss:$24 sps:$4 sm:$0xff]  }
  0x69   :  { %514 = vmatmul.mubr.bf16.vlgmr.msra.gmra.mxu0 %v73_v8  ;;  %555 = vmatmul.mubr.bf16.vlgmr.msra.gmra.mxu1 %v73_v8  ;;  %v3108_v8 = vld [vmem:[#allocation4 + $0x45c] ss:$24 sps:$4 sm:$0xff]  }
  0x6a   :  { %1756 = vmatpush1.bf16.msra.mxu0 %v3007_v9  ;;  %1797 = vmatpush1.bf16.msra.mxu1 %v3010_v10  ;;  %v141_v9 = vlaneseq }
  0x6b   :  { %1757 = vmatprep.subr.bf16.mxu0 %v3015_v11  ;;  %1798 = vmatprep.subr.bf16.mxu1 %v3018_v12 }
  0x6c   :  { %v3468_v10 = vshrl.u32 %v141_v9, 7  ;;  %v3154_v9 = vld [vmem:[#allocation4 + $0x5d8] ss:$24 sps:$4 sm:$0xff]  }
  0x6e   :  { %1758 = vmatpush1.bf16.msra.mxu0 %v3013_v13  ;;  %1799 = vmatpush1.bf16.msra.mxu1 %v3016_v14  ;;  %v143_v11 = vsub.s32 0, %v3468_v10  ;;  %v151_v12 = vsub.s32 2, %v3468_v10  ;;  %v139_v13 = vld [vmem:[%s3534_s2] sm:$0xf]  ;;  %v147_v14 = vsub.s32 1, %v3468_v10 }
  0x6f   :  { %1759 = vmatprep.subr.bf16.mxu0 %v3021_v15  ;;  %1800 = vmatprep.subr.bf16.mxu1 %v3024_v16  ;;  %v155_v15 = vsub.s32 3, %v3468_v10 }
  0x70   :  { %v144_v16 = vrot.slane %v139_v13, %v143_v11 }
  0x72   :  { %1760 = vmatpush1.bf16.msra.mxu0 %v3019_v17  ;;  %1801 = vmatpush1.bf16.msra.mxu1 %v3022_v18  ;;  %v152_v17 = vrot.slane %v139_v13, %v151_v12  ;;  %v148_v18 = vrot.slane %v139_v13, %v147_v14 }
  0x73   :  { %1761 = vmatprep.subr.bf16.mxu0 %v3027_v19  ;;  %1802 = vmatprep.subr.bf16.mxu1 %v3030_v20  ;;  %v156_v19 = vrot.slane %v139_v13, %v155_v15  ;;  %v3159_v13 = vld [vmem:[#allocation4 + $0x2ac] ss:$24 sps:$4 sm:$0xff]  }
  0x76   :  { %1762 = vmatpush1.bf16.msra.mxu0 %v3025_v21  ;;  %1803 = vmatpush1.bf16.msra.mxu1 %v3028_v22 }
  0x77   :  { %1763 = vmatprep.subr.bf16.mxu0 %v3033_v23  ;;  %1804 = vmatprep.subr.bf16.mxu1 %v3036_v24 }
  0x7a   :  { %1764 = vmatpush1.bf16.msra.mxu0 %v3031_v25  ;;  %1805 = vmatpush1.bf16.msra.mxu1 %v3034_v26 }
  0x7b   :  { %1765 = vmatprep.subr.bf16.mxu0 %v3039_v27  ;;  %1806 = vmatprep.subr.bf16.mxu1 %v3042_v28 }
  0x7e   :  { %1766 = vmatpush1.bf16.msra.mxu0 %v3037_v29  ;;  %1807 = vmatpush1.bf16.msra.mxu1 %v3040_v30 }
  0x7f   :  { %1767 = vmatprep.subr.bf16.mxu0 %v3045_v31  ;;  %1808 = vmatprep.subr.bf16.mxu1 %v3048_v32 }
  0x82   :  { %1768 = vmatpush1.bf16.msra.mxu0 %v3043_v33  ;;  %1809 = vmatpush1.bf16.msra.mxu1 %v3046_v34 }
  0x83   :  { %1769 = vmatprep.subr.bf16.mxu0 %v3051_v35  ;;  %1810 = vmatprep.subr.bf16.mxu1 %v3054_v36 }
  0x86   :  { %1770 = vmatpush1.bf16.msra.mxu0 %v3049_v37  ;;  %1811 = vmatpush1.bf16.msra.mxu1 %v3052_v38 }
  0x87   :  { %1771 = vmatprep.subr.bf16.mxu0 %v3057_v39  ;;  %1812 = vmatprep.subr.bf16.mxu1 %v3060_v40  ;;  %v3103_v39 = vld [vmem:[#allocation4 + $0x158] ss:$24 sps:$4 sm:$0xff]  }
  0x88   :  { %v3106_v40 = vld [vmem:[#allocation4 + $0x458] ss:$24 sps:$4 sm:$0xff]  }
  0x8a   :  { %1772 = vmatpush2.bf16.msra.mxu0 %v3055_v41  ;;  %1813 = vmatpush2.bf16.msra.mxu1 %v3058_v42  ;;  %v3111_v42 = vld [vmem:[#allocation4 + $0x12c] ss:$24 sps:$4 sm:$0xff]  }
  0x8b   :  { %1773 = vmatprep.subr.bf16.mxu0 %v3063_v43  ;;  %1814 = vmatprep.subr.bf16.mxu1 %v3066_v44  ;;  %v3114_v43 = vld [vmem:[#allocation4 + $0x42c] ss:$24 sps:$4 sm:$0xff]   ;;  %v3109_v44 = vld [vmem:[#allocation4 + $0x128] ss:$24 sps:$4 sm:$0xff]  }
  0x8e   :  { %1774 = vmatpush2.bf16.msra.mxu0 %v3061_v45  ;;  %1815 = vmatpush2.bf16.msra.mxu1 %v3064_v46  ;;  %v3112_v45 = vld [vmem:[#allocation4 + $0x428] ss:$24 sps:$4 sm:$0xff]   ;;  %v3117_v46 = vld [vmem:[#allocation4 + $0xfc] ss:$24 sps:$4 sm:$0xff]  }
  0x8f   :  { %1775 = vmatprep.subr.bf16.mxu0 %v3069_v47  ;;  %1816 = vmatprep.subr.bf16.mxu1 %v3072_v48  ;;  %v3120_v47 = vld [vmem:[#allocation4 + $0x3fc] ss:$24 sps:$4 sm:$0xff]   ;;  %v3115_v48 = vld [vmem:[#allocation4 + $0xf8] ss:$24 sps:$4 sm:$0xff]  }
  0x92   :  { %1776 = vmatpush2.bf16.msra.mxu0 %v3067_v49  ;;  %1817 = vmatpush2.bf16.msra.mxu1 %v3070_v50  ;;  %v3118_v49 = vld [vmem:[#allocation4 + $0x3f8] ss:$24 sps:$4 sm:$0xff]   ;;  %v3123_v50 = vld [vmem:[#allocation4 + $0xcc] ss:$24 sps:$4 sm:$0xff]  }
  0x93   :  { %1777 = vmatprep.subr.bf16.mxu0 %v3075_v51  ;;  %1818 = vmatprep.subr.bf16.mxu1 %v3078_v52  ;;  %v3126_v51 = vld [vmem:[#allocation4 + $0x3cc] ss:$24 sps:$4 sm:$0xff]   ;;  %v3121_v52 = vld [vmem:[#allocation4 + $0xc8] ss:$24 sps:$4 sm:$0xff]  }
  0x96   :  { %1778 = vmatpush2.bf16.msra.mxu0 %v3073_v53  ;;  %1819 = vmatpush2.bf16.msra.mxu1 %v3076_v54  ;;  %v3124_v53 = vld [vmem:[#allocation4 + $0x3c8] ss:$24 sps:$4 sm:$0xff]   ;;  %v3129_v54 = vld [vmem:[#allocation4 + $0x9c] ss:$24 sps:$4 sm:$0xff]  }
  0x97   :  { %1779 = vmatprep.subr.bf16.mxu0 %v3081_v55  ;;  %1820 = vmatprep.subr.bf16.mxu1 %v3084_v56  ;;  %v3132_v55 = vld [vmem:[#allocation4 + $0x39c] ss:$24 sps:$4 sm:$0xff]   ;;  %v3127_v56 = vld [vmem:[#allocation4 + $0x98] ss:$24 sps:$4 sm:$0xff]  }
  0x9a   :  { %1780 = vmatpush2.bf16.msra.mxu0 %v3079_v57  ;;  %1821 = vmatpush2.bf16.msra.mxu1 %v3082_v58  ;;  %v3130_v57 = vld [vmem:[#allocation4 + $0x398] ss:$24 sps:$4 sm:$0xff]   ;;  %v3135_v58 = vld [vmem:[#allocation4 + $0x6c] ss:$24 sps:$4 sm:$0xff]  }
  0x9b   :  { %1781 = vmatprep.subr.bf16.mxu0 %v3087_v59  ;;  %1822 = vmatprep.subr.bf16.mxu1 %v3090_v60  ;;  %v3138_v59 = vld [vmem:[#allocation4 + $0x36c] ss:$24 sps:$4 sm:$0xff]   ;;  %v3133_v60 = vld [vmem:[#allocation4 + $0x68] ss:$24 sps:$4 sm:$0xff]  }
  0x9e   :  { %1782 = vmatpush2.bf16.msra.mxu0 %v3085_v61  ;;  %1823 = vmatpush2.bf16.msra.mxu1 %v3088_v62  ;;  %v3136_v61 = vld [vmem:[#allocation4 + $0x368] ss:$24 sps:$4 sm:$0xff]   ;;  %v3141_v62 = vld [vmem:[#allocation4 + $0x3c] ss:$24 sps:$4 sm:$0xff]  }
  0x9f   :  { %1783 = vmatprep.subr.bf16.mxu0 %v3093_v63  ;;  %1824 = vmatprep.subr.bf16.mxu1 %v3096_v0  ;;  %v3144_v63 = vld [vmem:[#allocation4 + $0x33c] ss:$24 sps:$4 sm:$0xff]   ;;  %v3139_v0 = vld [vmem:[#allocation4 + $0x38] ss:$24 sps:$4 sm:$0xff]  }
  0xa2   :  { %1784 = vmatpush2.bf16.msra.mxu0 %v3091_v1  ;;  %1825 = vmatpush2.bf16.msra.mxu1 %v3094_v2  ;;  %v3142_v1 = vld [vmem:[#allocation4 + $0x338] ss:$24 sps:$4 sm:$0xff]   ;;  %v3147_v2 = vld [vmem:[#allocation4 + $0xc] ss:$24 sps:$4 sm:$0xff]  }
  0xa3   :  { %1785 = vmatprep.subr.bf16.mxu0 %v3099_v3  ;;  %1826 = vmatprep.subr.bf16.mxu1 %v3102_v4  ;;  %v3150_v3 = vld [vmem:[#allocation4 + $0x30c] ss:$24 sps:$4 sm:$0xff]   ;;  %v3145_v4 = vld [vmem:[#allocation4 + $0x8] ss:$24 sps:$4 sm:$0xff]  }
  0xa6   :  { %1786 = vmatpush2.bf16.msra.mxu0 %v3097_v5  ;;  %1827 = vmatpush2.bf16.msra.mxu1 %v3100_v6  ;;  %v3148_v5 = vld [vmem:[#allocation4 + $0x308] ss:$24 sps:$4 sm:$0xff]   ;;  %v3153_v6 = vld [vmem:[#allocation4 + $0x2dc] ss:$24 sps:$4 sm:$0xff]  }
  0xa7   :  { %1837 = vmatprep.subr.bf16.mxu0 %v3105_v7  ;;  %1878 = vmatprep.subr.bf16.mxu1 %v3108_v8  ;;  %v3156_v7 = vld [vmem:[#allocation4 + $0x5dc] ss:$24 sps:$4 sm:$0xff]   ;;  %v3151_v8 = vld [vmem:[#allocation4 + $0x2d8] ss:$24 sps:$4 sm:$0xff]  }
 0x129   :  { %v515_v20 = vpop.f32.mrf.mxu0  ;;  %v556_v21 = vpop.f32.mrf.mxu1 }
 0x12a   :  { %v516_v22 = vadd.f32 %v515_v20, %v144_v16  ;;  %v557_v23 = vadd.f32 %v556_v21, %v152_v17  ;;  %v3162_v16 = vld [vmem:[#allocation4 + $0x5ac] ss:$24 sps:$4 sm:$0xff]   ;;  %v3157_v17 = vld [vmem:[#allocation4 + $0x2a8] ss:$24 sps:$4 sm:$0xff]   ;;  %v3168_v20 = vld [vmem:[#allocation4 + $0x57c] ss:$24 sps:$4 sm:$0xff]  }
 0x12b   :  { %v517_v24 = vpop.f32.mrf.mxu0  ;;  %v558_v25 = vpop.f32.mrf.mxu1  ;;  %v3163_v21 = vld [vmem:[#allocation4 + $0x278] ss:$24 sps:$4 sm:$0xff]  }
 0x12c   :  { %v565_v26 = vmax.f32 %v557_v23, 0.0  ;;  %v518_v27 = vadd.f32 %v517_v24, %v148_v18  ;;  %v559_v28 = vadd.f32 %v558_v25, %v156_v19  ;;  %v563_v29 = vmax.f32 %v516_v22, 0.0  ;;  %v3160_v18 = vld [vmem:[#allocation4 + $0x5a8] ss:$24 sps:$4 sm:$0xff]   ;;  %v3165_v19 = vld [vmem:[#allocation4 + $0x27c] ss:$24 sps:$4 sm:$0xff]  }
 0x12d   :  { %v519_v30 = vpop.f32.mrf.mxu0  ;;  %v560_v31 = vpop.f32.mrf.mxu1  ;;  %v3166_v22 = vld [vmem:[#allocation4 + $0x578] ss:$24 sps:$4 sm:$0xff]   ;;  %v3171_v23 = vld [vmem:[#allocation4 + $0x24c] ss:$24 sps:$4 sm:$0xff]   ;;  %v3169_v25 = vld [vmem:[#allocation4 + $0x248] ss:$24 sps:$4 sm:$0xff]  }
 0x12e   :  { %v564_v32 = vmax.f32 %v518_v27, 0.0  ;;  %v566_v33 = vmax.f32 %v559_v28, 0.0  ;;  %v3485_v34 = vpack.c.bf16 %v565_v26, %v565_v26  ;;  %v3491_v41 = vpack.c.bf16 %v563_v29, %v563_v29  ;;  %v3174_v24 = vld [vmem:[#allocation4 + $0x54c] ss:$24 sps:$4 sm:$0xff]   ;;  %v3172_v26 = vld [vmem:[#allocation4 + $0x548] ss:$24 sps:$4 sm:$0xff]  }
 0x12f   :  { %v520_v35 = vpop.f32.mrf.mxu0  ;;  %v561_v36 = vpop.f32.mrf.mxu1  ;;  %v3177_v27 = vld [vmem:[#allocation4 + $0x21c] ss:$24 sps:$4 sm:$0xff]   ;;  %v3175_v29 = vld [vmem:[#allocation4 + $0x218] ss:$24 sps:$4 sm:$0xff]   ;;  %v3183_v31 = vld [vmem:[#allocation4 + $0x1ec] ss:$24 sps:$4 sm:$0xff]  }
 0x130   :  { %v3487_v37 = vpack.c.bf16 %v564_v32, %v564_v32  ;;  %v3489_v38 = vpack.c.bf16 %v566_v33, %v566_v33  ;;  %v3180_v28 = vld [vmem:[#allocation4 + $0x51c] ss:$24 sps:$4 sm:$0xff]   ;;  %v3178_v30 = vld [vmem:[#allocation4 + $0x518] ss:$24 sps:$4 sm:$0xff]   ;;  %v3186_v32 = vld [vmem:[#allocation4 + $0x4ec] ss:$24 sps:$4 sm:$0xff]  }
 0x131   :  { %v3181_v33 = vld [vmem:[#allocation4 + $0x1e8] ss:$24 sps:$4 sm:$0xff]   ;;  %v3189_v36 = vld [vmem:[#allocation4 + $0x1bc] ss:$24 sps:$4 sm:$0xff]  }
 0x132   :  { %1787 = vmatprep.mubr.bf16.mxu0 %v3487_v37  ;;  %1828 = vmatprep.mubr.bf16.mxu1 %v3489_v38  ;;  %v3184_v35 = vld [vmem:[#allocation4 + $0x4e8] ss:$24 sps:$4 sm:$0xff]  }
 0x133   :  { %1788 = vmatmul.mubr.bf16.vlgmr.msra.gmra.mxu0 %v3491_v41  ;;  %1829 = vmatmul.mubr.bf16.vlgmr.msra.gmra.mxu1 %v3485_v34 }
 0x134   :  { %1838 = vmatpush1.bf16.msra.mxu0 %v3103_v39  ;;  %1879 = vmatpush1.bf16.msra.mxu1 %v3106_v40  ;;  %v3192_v39 = vld [vmem:[#allocation4 + $0x4bc] ss:$24 sps:$4 sm:$0xff]   ;;  %v3187_v40 = vld [vmem:[#allocation4 + $0x1b8] ss:$24 sps:$4 sm:$0xff]  }
 0x135   :  { %1869 = vmatprep.mubr.bf16.mxu0 %v3487_v37  ;;  %1910 = vmatprep.mubr.bf16.mxu1 %v3489_v38 }
 0x136   :  { %1839 = vmatprep.subr.bf16.mxu0 %v3111_v42  ;;  %1880 = vmatprep.subr.bf16.mxu1 %v3114_v43  ;;  %v3190_v42 = vld [vmem:[#allocation4 + $0x4b8] ss:$24 sps:$4 sm:$0xff]   ;;  %v3195_v43 = vld [vmem:[#allocation4 + $0x18c] ss:$24 sps:$4 sm:$0xff]  }
 0x138   :  { %1840 = vmatpush1.bf16.msra.mxu0 %v3109_v44  ;;  %1881 = vmatpush1.bf16.msra.mxu1 %v3112_v45  ;;  %v3198_v44 = vld [vmem:[#allocation4 + $0x48c] ss:$24 sps:$4 sm:$0xff]   ;;  %v3193_v45 = vld [vmem:[#allocation4 + $0x188] ss:$24 sps:$4 sm:$0xff]  }
 0x139   :  { %1841 = vmatprep.subr.bf16.mxu0 %v3117_v46  ;;  %1882 = vmatprep.subr.bf16.mxu1 %v3120_v47  ;;  %v3196_v46 = vld [vmem:[#allocation4 + $0x488] ss:$24 sps:$4 sm:$0xff]   ;;  %v3201_v47 = vld [vmem:[#allocation4 + $0x164] ss:$24 sps:$4 sm:$0xff]  }
 0x13c   :  { %1842 = vmatpush1.bf16.msra.mxu0 %v3115_v48  ;;  %1883 = vmatpush1.bf16.msra.mxu1 %v3118_v49  ;;  %v3204_v48 = vld [vmem:[#allocation4 + $0x464] ss:$24 sps:$4 sm:$0xff]   ;;  %v3199_v49 = vld [vmem:[#allocation4 + $0x160] ss:$24 sps:$4 sm:$0xff]  }
 0x13d   :  { %1843 = vmatprep.subr.bf16.mxu0 %v3123_v50  ;;  %1884 = vmatprep.subr.bf16.mxu1 %v3126_v51  ;;  %v3202_v50 = vld [vmem:[#allocation4 + $0x460] ss:$24 sps:$4 sm:$0xff]   ;;  %v3207_v51 = vld [vmem:[#allocation4 + $0x134] ss:$24 sps:$4 sm:$0xff]  }
 0x140   :  { %1844 = vmatpush1.bf16.msra.mxu0 %v3121_v52  ;;  %1885 = vmatpush1.bf16.msra.mxu1 %v3124_v53  ;;  %v3210_v52 = vld [vmem:[#allocation4 + $0x434] ss:$24 sps:$4 sm:$0xff]   ;;  %v3205_v53 = vld [vmem:[#allocation4 + $0x130] ss:$24 sps:$4 sm:$0xff]  }
 0x141   :  { %1845 = vmatprep.subr.bf16.mxu0 %v3129_v54  ;;  %1886 = vmatprep.subr.bf16.mxu1 %v3132_v55  ;;  %v3208_v54 = vld [vmem:[#allocation4 + $0x430] ss:$24 sps:$4 sm:$0xff]   ;;  %v3213_v55 = vld [vmem:[#allocation4 + $0x104] ss:$24 sps:$4 sm:$0xff]  }
 0x144   :  { %1846 = vmatpush1.bf16.msra.mxu0 %v3127_v56  ;;  %1887 = vmatpush1.bf16.msra.mxu1 %v3130_v57  ;;  %v3216_v56 = vld [vmem:[#allocation4 + $0x404] ss:$24 sps:$4 sm:$0xff]   ;;  %v3211_v57 = vld [vmem:[#allocation4 + $0x100] ss:$24 sps:$4 sm:$0xff]  }
 0x145   :  { %1847 = vmatprep.subr.bf16.mxu0 %v3135_v58  ;;  %1888 = vmatprep.subr.bf16.mxu1 %v3138_v59  ;;  %v3214_v58 = vld [vmem:[#allocation4 + $0x400] ss:$24 sps:$4 sm:$0xff]   ;;  %v3219_v59 = vld [vmem:[#allocation4 + $0xd4] ss:$24 sps:$4 sm:$0xff]  }
 0x148   :  { %1848 = vmatpush1.bf16.msra.mxu0 %v3133_v60  ;;  %1889 = vmatpush1.bf16.msra.mxu1 %v3136_v61  ;;  %v3222_v60 = vld [vmem:[#allocation4 + $0x3d4] ss:$24 sps:$4 sm:$0xff]   ;;  %v3217_v61 = vld [vmem:[#allocation4 + $0xd0] ss:$24 sps:$4 sm:$0xff]  }
 0x149   :  { %1849 = vmatprep.subr.bf16.mxu0 %v3141_v62  ;;  %1890 = vmatprep.subr.bf16.mxu1 %v3144_v63  ;;  %v3225_v62 = vld [vmem:[#allocation4 + $0xa4] ss:$24 sps:$4 sm:$0xff]   ;;  %v3223_v63 = vld [vmem:[#allocation4 + $0xa0] ss:$24 sps:$4 sm:$0xff]  }
 0x14c   :  { %1850 = vmatpush1.bf16.msra.mxu0 %v3139_v0  ;;  %1891 = vmatpush1.bf16.msra.mxu1 %v3142_v1  ;;  %v3226_v0 = vld [vmem:[#allocation4 + $0x3a0] ss:$24 sps:$4 sm:$0xff]   ;;  %v3231_v1 = vld [vmem:[#allocation4 + $0x74] ss:$24 sps:$4 sm:$0xff]  }
 0x14d   :  { %1851 = vmatprep.subr.bf16.mxu0 %v3147_v2  ;;  %1892 = vmatprep.subr.bf16.mxu1 %v3150_v3  ;;  %v3234_v2 = vld [vmem:[#allocation4 + $0x374] ss:$24 sps:$4 sm:$0xff]   ;;  %v3229_v3 = vld [vmem:[#allocation4 + $0x70] ss:$24 sps:$4 sm:$0xff]  }
 0x150   :  { %1852 = vmatpush1.bf16.msra.mxu0 %v3145_v4  ;;  %1893 = vmatpush1.bf16.msra.mxu1 %v3148_v5  ;;  %v3232_v4 = vld [vmem:[#allocation4 + $0x370] ss:$24 sps:$4 sm:$0xff]   ;;  %v3237_v5 = vld [vmem:[#allocation4 + $0x44] ss:$24 sps:$4 sm:$0xff]  }
 0x151   :  { %1853 = vmatprep.subr.bf16.mxu0 %v3153_v6  ;;  %1894 = vmatprep.subr.bf16.mxu1 %v3156_v7  ;;  %v3240_v6 = vld [vmem:[#allocation4 + $0x344] ss:$24 sps:$4 sm:$0xff]   ;;  %v3235_v7 = vld [vmem:[#allocation4 + $0x40] ss:$24 sps:$4 sm:$0xff]  }
 0x154   :  { %1854 = vmatpush2.bf16.msra.mxu0 %v3151_v8  ;;  %1895 = vmatpush2.bf16.msra.mxu1 %v3154_v9  ;;  %v3238_v8 = vld [vmem:[#allocation4 + $0x340] ss:$24 sps:$4 sm:$0xff]   ;;  %v3243_v9 = vld [vmem:[#allocation4 + $0x14] ss:$24 sps:$4 sm:$0xff]  }
 0x155   :  { %1855 = vmatprep.subr.bf16.mxu0 %v3159_v13  ;;  %1896 = vmatprep.subr.bf16.mxu1 %v3162_v16  ;;  %v3246_v13 = vld [vmem:[#allocation4 + $0x314] ss:$24 sps:$4 sm:$0xff]   ;;  %v3241_v16 = vld [vmem:[#allocation4 + $0x10] ss:$24 sps:$4 sm:$0xff]  }
 0x158   :  { %1856 = vmatpush2.bf16.msra.mxu0 %v3157_v17  ;;  %1897 = vmatpush2.bf16.msra.mxu1 %v3160_v18  ;;  %v3244_v17 = vld [vmem:[#allocation4 + $0x310] ss:$24 sps:$4 sm:$0xff]   ;;  %v3249_v18 = vld [vmem:[#allocation4 + $0x2e4] ss:$24 sps:$4 sm:$0xff]  }
 0x159   :  { %1857 = vmatprep.subr.bf16.mxu0 %v3165_v19  ;;  %1898 = vmatprep.subr.bf16.mxu1 %v3168_v20  ;;  %v3252_v19 = vld [vmem:[#allocation4 + $0x5e4] ss:$24 sps:$4 sm:$0xff]   ;;  %v3247_v20 = vld [vmem:[#allocation4 + $0x2e0] ss:$24 sps:$4 sm:$0xff]  }
 0x15c   :  { %1858 = vmatpush2.bf16.msra.mxu0 %v3163_v21  ;;  %1899 = vmatpush2.bf16.msra.mxu1 %v3166_v22  ;;  %v3250_v21 = vld [vmem:[#allocation4 + $0x5e0] ss:$24 sps:$4 sm:$0xff]   ;;  %v3255_v22 = vld [vmem:[#allocation4 + $0x2b4] ss:$24 sps:$4 sm:$0xff]  }
 0x15d   :  { %1859 = vmatprep.subr.bf16.mxu0 %v3171_v23  ;;  %1900 = vmatprep.subr.bf16.mxu1 %v3174_v24  ;;  %v3258_v23 = vld [vmem:[#allocation4 + $0x5b4] ss:$24 sps:$4 sm:$0xff]   ;;  %v3253_v24 = vld [vmem:[#allocation4 + $0x2b0] ss:$24 sps:$4 sm:$0xff]  }
 0x160   :  { %1860 = vmatpush2.bf16.msra.mxu0 %v3169_v25  ;;  %1901 = vmatpush2.bf16.msra.mxu1 %v3172_v26  ;;  %v3256_v25 = vld [vmem:[#allocation4 + $0x5b0] ss:$24 sps:$4 sm:$0xff]   ;;  %v3261_v26 = vld [vmem:[#allocation4 + $0x284] ss:$24 sps:$4 sm:$0xff]  }
 0x161   :  { %1861 = vmatprep.subr.bf16.mxu0 %v3177_v27  ;;  %1902 = vmatprep.subr.bf16.mxu1 %v3180_v28  ;;  %v3264_v27 = vld [vmem:[#allocation4 + $0x584] ss:$24 sps:$4 sm:$0xff]   ;;  %v3259_v28 = vld [vmem:[#allocation4 + $0x280] ss:$24 sps:$4 sm:$0xff]  }
 0x164   :  { %1862 = vmatpush2.bf16.msra.mxu0 %v3175_v29  ;;  %1903 = vmatpush2.bf16.msra.mxu1 %v3178_v30  ;;  %v3262_v29 = vld [vmem:[#allocation4 + $0x580] ss:$24 sps:$4 sm:$0xff]   ;;  %v3267_v30 = vld [vmem:[#allocation4 + $0x254] ss:$24 sps:$4 sm:$0xff]  }
 0x165   :  { %1863 = vmatprep.subr.bf16.mxu0 %v3183_v31  ;;  %1904 = vmatprep.subr.bf16.mxu1 %v3186_v32  ;;  %v3270_v31 = vld [vmem:[#allocation4 + $0x554] ss:$24 sps:$4 sm:$0xff]   ;;  %v3265_v32 = vld [vmem:[#allocation4 + $0x250] ss:$24 sps:$4 sm:$0xff]  }
 0x168   :  { %1864 = vmatpush2.bf16.msra.mxu0 %v3181_v33  ;;  %1905 = vmatpush2.bf16.msra.mxu1 %v3184_v35  ;;  %v3268_v33 = vld [vmem:[#allocation4 + $0x550] ss:$24 sps:$4 sm:$0xff]   ;;  %v3273_v35 = vld [vmem:[#allocation4 + $0x224] ss:$24 sps:$4 sm:$0xff]  }
 0x169   :  { %1865 = vmatprep.subr.bf16.mxu0 %v3189_v36  ;;  %1906 = vmatprep.subr.bf16.mxu1 %v3192_v39  ;;  %v3276_v36 = vld [vmem:[#allocation4 + $0x524] ss:$24 sps:$4 sm:$0xff]   ;;  %v3271_v39 = vld [vmem:[#allocation4 + $0x220] ss:$24 sps:$4 sm:$0xff]  }
 0x16c   :  { %1866 = vmatpush2.bf16.msra.mxu0 %v3187_v40  ;;  %1907 = vmatpush2.bf16.msra.mxu1 %v3190_v42  ;;  %v3274_v40 = vld [vmem:[#allocation4 + $0x520] ss:$24 sps:$4 sm:$0xff]   ;;  %v3279_v42 = vld [vmem:[#allocation4 + $0x1f4] ss:$24 sps:$4 sm:$0xff]  }
 0x16d   :  { %1867 = vmatprep.subr.bf16.mxu0 %v3195_v43  ;;  %1908 = vmatprep.subr.bf16.mxu1 %v3198_v44  ;;  %v3282_v43 = vld [vmem:[#allocation4 + $0x4f4] ss:$24 sps:$4 sm:$0xff]   ;;  %v3277_v44 = vld [vmem:[#allocation4 + $0x1f0] ss:$24 sps:$4 sm:$0xff]  }
 0x170   :  { %1868 = vmatpush2.bf16.msra.mxu0 %v3193_v45  ;;  %1909 = vmatpush2.bf16.msra.mxu1 %v3196_v46  ;;  %v3280_v45 = vld [vmem:[#allocation4 + $0x4f0] ss:$24 sps:$4 sm:$0xff]   ;;  %v3285_v46 = vld [vmem:[#allocation4 + $0x1c4] ss:$24 sps:$4 sm:$0xff]  }
 0x171   :  { %1919 = vmatprep.subr.bf16.mxu0 %v3201_v47  ;;  %1960 = vmatprep.subr.bf16.mxu1 %v3204_v48  ;;  %v3288_v47 = vld [vmem:[#allocation4 + $0x4c4] ss:$24 sps:$4 sm:$0xff]   ;;  %v3283_v48 = vld [vmem:[#allocation4 + $0x1c0] ss:$24 sps:$4 sm:$0xff]  }
 0x173   :  { %1870 = vmatmul.mubr.bf16.vlgmr.msra.gmra.mxu0 %v3491_v41  ;;  %1911 = vmatmul.mubr.bf16.vlgmr.msra.gmra.mxu1 %v3485_v34 }
 0x174   :  { %1920 = vmatpush1.bf16.msra.mxu0 %v3199_v49  ;;  %1951 = vmatprep.mubr.bf16.mxu0 %v3487_v37  ;;  %v3220_v37 = vld [vmem:[#allocation4 + $0x3d0] ss:$24 sps:$4 sm:$0xff]   ;;  %v3286_v49 = vld [vmem:[#allocation4 + $0x4c0] ss:$24 sps:$4 sm:$0xff]  }
 0x175   :  { %1961 = vmatpush1.bf16.msra.mxu1 %v3202_v50  ;;  %1992 = vmatprep.mubr.bf16.mxu1 %v3489_v38  ;;  %v3228_v38 = vld [vmem:[#allocation4 + $0x3a4] ss:$24 sps:$4 sm:$0xff]   ;;  %v3291_v50 = vld [vmem:[#allocation4 + $0x194] ss:$24 sps:$4 sm:$0xff]  }
 0x176   :  { %1921 = vmatprep.subr.bf16.mxu0 %v3207_v51  ;;  %1962 = vmatprep.subr.bf16.mxu1 %v3210_v52  ;;  %v3294_v51 = vld [vmem:[#allocation4 + $0x494] ss:$24 sps:$4 sm:$0xff]   ;;  %v3289_v52 = vld [vmem:[#allocation4 + $0x190] ss:$24 sps:$4 sm:$0xff]  }
 0x178   :  { %1922 = vmatpush1.bf16.msra.mxu0 %v3205_v53  ;;  %v3292_v53 = vld [vmem:[#allocation4 + $0x490] ss:$24 sps:$4 sm:$0xff]  }
 0x179   :  { %1963 = vmatpush1.bf16.msra.mxu1 %v3208_v54  ;;  %1923 = vmatprep.subr.bf16.mxu0 %v3213_v55  ;;  %v3295_v54 = vld [vmem:[#allocation6 + $0x78] sm:$0xff]  }
 0x17a   :  { %1964 = vmatprep.subr.bf16.mxu1 %v3216_v56  ;;  %v3311_v55 = vld [vmem:[#allocation6 + $0xf8] sm:$0xff]  }
 0x17b   :  { %v3296_v56 = vld [vmem:[#allocation6 + $0x38] sm:$0xff]  }
 0x17c   :  { %1924 = vmatpush1.bf16.msra.mxu0 %v3211_v57  ;;  %v3297_v57 = vld [vmem:[#allocation6 + $0x70] sm:$0xff]  }
 0x17d   :  { %1965 = vmatpush1.bf16.msra.mxu1 %v3214_v58  ;;  %1925 = vmatprep.subr.bf16.mxu0 %v3219_v59  ;;  %v3312_v58 = vld [vmem:[#allocation6 + $0xb8] sm:$0xff]   ;;  %v3313_v59 = vld [vmem:[#allocation6 + $0xf0] sm:$0xff]  }
 0x17e   :  { %1966 = vmatprep.subr.bf16.mxu1 %v3222_v60  ;;  %v3298_v60 = vld [vmem:[#allocation6 + $0x30] sm:$0xff]  }
 0x180   :  { %1926 = vmatpush1.bf16.msra.mxu0 %v3217_v61  ;;  %v3299_v61 = vld [vmem:[#allocation6 + $0x68] sm:$0xff]  }
 0x181   :  { %1967 = vmatpush1.bf16.msra.mxu1 %v3220_v37  ;;  %1927 = vmatprep.subr.bf16.mxu0 %v3225_v62  ;;  %v3314_v37 = vld [vmem:[#allocation6 + $0xb0] sm:$0xff]   ;;  %v3315_v62 = vld [vmem:[#allocation6 + $0xe8] sm:$0xff]  }
 0x182   :  { %1968 = vmatprep.subr.bf16.mxu1 %v3228_v38  ;;  %v3300_v38 = vld [vmem:[#allocation6 + $0x28] sm:$0xff]  }
 0x184   :  { %1928 = vmatpush1.bf16.msra.mxu0 %v3223_v63  ;;  %v3301_v63 = vld [vmem:[#allocation6 + $0x60] sm:$0xff]  }
 0x185   :  { %1969 = vmatpush1.bf16.msra.mxu1 %v3226_v0  ;;  %1929 = vmatprep.subr.bf16.mxu0 %v3231_v1  ;;  %v3316_v0 = vld [vmem:[#allocation6 + $0xa8] sm:$0xff]   ;;  %v3317_v1 = vld [vmem:[#allocation6 + $0xe0] sm:$0xff]  }
 0x186   :  { %1970 = vmatprep.subr.bf16.mxu1 %v3234_v2  ;;  %v3318_v2 = vld [vmem:[#allocation6 + $0xa0] sm:$0xff]  }
 0x188   :  { %1930 = vmatpush1.bf16.msra.mxu0 %v3229_v3  ;;  %v3319_v3 = vld [vmem:[#allocation6 + $0xd8] sm:$0xff]  }
 0x189   :  { %1971 = vmatpush1.bf16.msra.mxu1 %v3232_v4  ;;  %1931 = vmatprep.subr.bf16.mxu0 %v3237_v5  ;;  %v3304_v4 = vld [vmem:[#allocation6 + $0x18] sm:$0xff]   ;;  %v3305_v5 = vld [vmem:[#allocation6 + $0x50] sm:$0xff]  }
 0x18a   :  { %1972 = vmatprep.subr.bf16.mxu1 %v3240_v6  ;;  %v3320_v6 = vld [vmem:[#allocation6 + $0x98] sm:$0xff]  }
 0x18c   :  { %1932 = vmatpush1.bf16.msra.mxu0 %v3235_v7  ;;  %v3321_v7 = vld [vmem:[#allocation6 + $0xd0] sm:$0xff]  }
 0x18d   :  { %1973 = vmatpush1.bf16.msra.mxu1 %v3238_v8  ;;  %1933 = vmatprep.subr.bf16.mxu0 %v3243_v9  ;;  %v3306_v8 = vld [vmem:[#allocation6 + $0x10] sm:$0xff]   ;;  %v3307_v9 = vld [vmem:[#allocation6 + $0x48] sm:$0xff]  }
 0x18e   :  { %1974 = vmatprep.subr.bf16.mxu1 %v3246_v13  ;;  %v3322_v13 = vld [vmem:[#allocation6 + $0x90] sm:$0xff]  }
 0x190   :  { %1934 = vmatpush1.bf16.msra.mxu0 %v3241_v16  ;;  %v3323_v16 = vld [vmem:[#allocation6 + $0xc8] sm:$0xff]  }
 0x191   :  { %1975 = vmatpush1.bf16.msra.mxu1 %v3244_v17  ;;  %1935 = vmatprep.subr.bf16.mxu0 %v3249_v18  ;;  %v3308_v17 = vld [vmem:[#allocation6 + $0x8] sm:$0xff]   ;;  %v3309_v18 = vld [vmem:[#allocation6 + $0x40] sm:$0xff]  }
 0x192   :  { %1976 = vmatprep.subr.bf16.mxu1 %v3252_v19  ;;  %v3324_v19 = vld [vmem:[#allocation6 + $0x88] sm:$0xff]  }
 0x194   :  { %1936 = vmatpush2.bf16.msra.mxu0 %v3247_v20  ;;  %v3325_v20 = vld [vmem:[#allocation6 + $0xc0] sm:$0xff]  }
 0x195   :  { %1977 = vmatpush2.bf16.msra.mxu1 %v3250_v21  ;;  %1937 = vmatprep.subr.bf16.mxu0 %v3255_v22  ;;  %v3310_v21 = vld [vmem:[#allocation6] sm:$0xff]  }
 0x196   :  { %1978 = vmatprep.subr.bf16.mxu1 %v3258_v23  ;;  %v3326_v22 = vld [vmem:[#allocation6 + $0x80] sm:$0xff]   ;;  %v3327_v23 = vld [vmem:[#allocation6 + $0x178] sm:$0xff]  }
 0x198   :  { %1938 = vmatpush2.bf16.msra.mxu0 %v3253_v24  ;;  %v3508_v24 = vld [vmem:[%s3536_s4] sm:$0x3f] }
 0x199   :  { %1979 = vmatpush2.bf16.msra.mxu1 %v3256_v25  ;;  %1939 = vmatprep.subr.bf16.mxu0 %v3261_v26  ;;  %v768_v25 = vrot.slane %v3508_v24, %v143_v11  ;;  %v772_v26 = vrot.slane %v3508_v24, %v147_v14  ;;  %v3328_v11 = vld [vmem:[#allocation6 + $0x138] sm:$0xff]   ;;  %v3330_v14 = vld [vmem:[#allocation6 + $0x130] sm:$0xff]  }
 0x19a   :  { %1980 = vmatprep.subr.bf16.mxu1 %v3264_v27 }
 0x19c   :  { %1940 = vmatpush2.bf16.msra.mxu0 %v3259_v28 }
 0x19d   :  { %1981 = vmatpush2.bf16.msra.mxu1 %v3262_v29  ;;  %1941 = vmatprep.subr.bf16.mxu0 %v3267_v30 }
 0x19e   :  { %1982 = vmatprep.subr.bf16.mxu1 %v3270_v31 }
 0x1a0   :  { %1942 = vmatpush2.bf16.msra.mxu0 %v3265_v32 }
 0x1a1   :  { %1983 = vmatpush2.bf16.msra.mxu1 %v3268_v33  ;;  %1943 = vmatprep.subr.bf16.mxu0 %v3273_v35 }
 0x1a2   :  { %1984 = vmatprep.subr.bf16.mxu1 %v3276_v36 }
 0x1a4   :  { %1944 = vmatpush2.bf16.msra.mxu0 %v3271_v39 }
 0x1a5   :  { %1985 = vmatpush2.bf16.msra.mxu1 %v3274_v40  ;;  %1945 = vmatprep.subr.bf16.mxu0 %v3279_v42 }
 0x1a6   :  { %1986 = vmatprep.subr.bf16.mxu1 %v3282_v43 }
 0x1a8   :  { %1946 = vmatpush2.bf16.msra.mxu0 %v3277_v44 }
 0x1a9   :  { %1987 = vmatpush2.bf16.msra.mxu1 %v3280_v45  ;;  %1947 = vmatprep.subr.bf16.mxu0 %v3285_v46 }
 0x1aa   :  { %1988 = vmatprep.subr.bf16.mxu1 %v3288_v47  ;;  %v3329_v47 = vld [vmem:[#allocation6 + $0x170] sm:$0xff]  }
 0x1ac   :  { %1948 = vmatpush2.bf16.msra.mxu0 %v3283_v48  ;;  %v3331_v48 = vld [vmem:[#allocation6 + $0x168] sm:$0xff]  }
 0x1ad   :  { %1989 = vmatpush2.bf16.msra.mxu1 %v3286_v49  ;;  %1949 = vmatprep.subr.bf16.mxu0 %v3291_v50  ;;  %v3332_v49 = vld [vmem:[#allocation6 + $0x128] sm:$0xff]   ;;  %v3333_v50 = vld [vmem:[#allocation6 + $0x160] sm:$0xff]  }
 0x1ae   :  { %1990 = vmatprep.subr.bf16.mxu1 %v3294_v51  ;;  %v3334_v51 = vld [vmem:[#allocation6 + $0x120] sm:$0xff]  }
 0x1b0   :  { %1950 = vmatpush2.bf16.msra.mxu0 %v3289_v52  ;;  %v3335_v52 = vld [vmem:[#allocation6 + $0x158] sm:$0xff]  }
 0x1b1   :  { %1991 = vmatpush2.bf16.msra.mxu1 %v3292_v53  ;;  %2836 = vmatprep.subr.bf16.mxu0 %v3295_v54  ;;  %v3336_v53 = vld [vmem:[#allocation6 + $0x118] sm:$0xff]   ;;  %v3337_v54 = vld [vmem:[#allocation6 + $0x150] sm:$0xff]  }
 0x1b2   :  { %2858 = vmatprep.subr.bf16.mxu1 %v3311_v55  ;;  %v3338_v55 = vld [vmem:[#allocation6 + $0x110] sm:$0xff]  }
 0x1b3   :  { %1952 = vmatmul.mubr.bf16.vlgmr.msra.gmra.mxu0 %v3491_v41  ;;  %v3302_v41 = vld [vmem:[#allocation6 + $0x20] sm:$0xff]  }
 0x1b4   :  { %1993 = vmatmul.mubr.bf16.vlgmr.msra.gmra.mxu1 %v3485_v34  ;;  %2837 = vmatpush3.bf16.msra.mxu0 %v3296_v56  ;;  %v3303_v34 = vld [vmem:[#allocation6 + $0x58] sm:$0xff]   ;;  %v3339_v56 = vld [vmem:[#allocation6 + $0x148] sm:$0xff]  }
 0x1b5   :  { %2838 = vmatprep.subr.bf16.mxu0 %v3297_v57  ;;  %2859 = vmatpush3.bf16.msra.mxu1 %v3312_v58  ;;  %v3340_v57 = vld [vmem:[#allocation6 + $0x108] sm:$0xff]   ;;  %v3341_v58 = vld [vmem:[#allocation6 + $0x140] sm:$0xff]  }
 0x1b6   :  { %2860 = vmatprep.subr.bf16.mxu1 %v3313_v59  ;;  %v3342_v59 = vld [vmem:[#allocation6 + $0x100] sm:$0xff]  }
 0x1b8   :  { %2839 = vmatpush3.bf16.msra.mxu0 %v3298_v60  ;;  %v776_v60 = vrot.slane %v3508_v24, %v151_v12 }
 0x1b9   :  { %2840 = vmatprep.subr.bf16.mxu0 %v3299_v61  ;;  %2861 = vmatpush3.bf16.msra.mxu1 %v3314_v37  ;;  %v780_v61 = vrot.slane %v3508_v24, %v155_v15  ;;  %v783_v15 = vsub.s32 4, %v3468_v10 }
 0x1ba   :  { %2862 = vmatprep.subr.bf16.mxu1 %v3315_v62 }
 0x1bc   :  { %2841 = vmatpush3.bf16.msra.mxu0 %v3300_v38 }
 0x1bd   :  { %2842 = vmatprep.subr.bf16.mxu0 %v3301_v63  ;;  %2863 = vmatpush3.bf16.msra.mxu1 %v3316_v0 }
 0x1be   :  { %2864 = vmatprep.subr.bf16.mxu1 %v3317_v1 }
 0x1c0   :  { %2843 = vmatpush3.bf16.msra.mxu0 %v3302_v41 }
 0x1c1   :  { %2844 = vmatprep.subr.bf16.mxu0 %v3303_v34  ;;  %2865 = vmatpush3.bf16.msra.mxu1 %v3318_v2 }
 0x1c2   :  { %2866 = vmatprep.subr.bf16.mxu1 %v3319_v3 }
 0x1c4   :  { %2845 = vmatpush3.bf16.msra.mxu0 %v3304_v4 }
 0x1c5   :  { %2846 = vmatprep.subr.bf16.mxu0 %v3305_v5  ;;  %2867 = vmatpush3.bf16.msra.mxu1 %v3320_v6 }
 0x1c6   :  { %2868 = vmatprep.subr.bf16.mxu1 %v3321_v7 }
 0x1c8   :  { %2847 = vmatpush3.bf16.msra.mxu0 %v3306_v8 }
 0x1c9   :  { %2848 = vmatprep.subr.bf16.mxu0 %v3307_v9  ;;  %2869 = vmatpush3.bf16.msra.mxu1 %v3322_v13  ;;  %v787_v9 = vsub.s32 5, %v3468_v10  ;;  %v784_v13 = vrot.slane %v3508_v24, %v783_v15 }
 0x1ca   :  { %2870 = vmatprep.subr.bf16.mxu1 %v3323_v16 }
 0x1cb   :  { %v788_v16 = vrot.slane %v3508_v24, %v787_v9 }
 0x1cc   :  { %2849 = vmatpush3.bf16.msra.mxu0 %v3308_v17 }
 0x1cd   :  { %2850 = vmatprep.subr.bf16.mxu0 %v3309_v18  ;;  %2871 = vmatpush3.bf16.msra.mxu1 %v3324_v19 }
 0x1ce   :  { %2872 = vmatprep.subr.bf16.mxu1 %v3325_v20 }
 0x1d0   :  { %2851 = vmatpush3.bf16.msra.mxu0 %v3310_v21 }
 0x1d1   :  { %2873 = vmatpush3.bf16.msra.mxu1 %v3326_v22  ;;  %2880 = vmatprep.subr.bf16.mxu0 %v3327_v23 }
 0x1f3   :  { %v1789_v27 = vpop.f32.mrf.mxu0  ;;  %v1830_v28 = vpop.f32.mrf.mxu1 }
 0x1f4   :  { %v1790_v29 = vadd.f32 %v1789_v27, %v768_v25 }
 0x1f5   :  { %v1791_v30 = vpop.f32.mrf.mxu0  ;;  %v1832_v31 = vpop.f32.mrf.mxu1 }
 0x1f6   :  { %v1831_v32 = vadd.f32 %v1830_v28, %v1790_v29  ;;  %v1792_v33 = vadd.f32 %v1791_v30, %v772_v26 }
 0x1f7   :  { %v1793_v35 = vpop.f32.mrf.mxu0  ;;  %v1834_v36 = vpop.f32.mrf.mxu1 }
 0x1f8   :  { %v1833_v39 = vadd.f32 %v1832_v31, %v1792_v33  ;;  %v2001_v40 = vmax.f32 %v1831_v32, 0.0 }
 0x1f9   :  { %v1794_v42 = vpop.f32.mrf.mxu0  ;;  %v1835_v43 = vpop.f32.mrf.mxu1 }
 0x1fa   :  { %v2002_v44 = vmax.f32 %v1833_v39, 0.0  ;;  %v2007_v46 = vpack.c.bf16 %v2001_v40, %v2001_v40  ;;  %v2787_v40 = vld [vmem:[%s3538_s6] ss:$0 sm:$0xff] }
 0x1fc   :  { %v2008_v45 = vpack.c.bf16 %v2002_v44, %v2002_v44 }
 0x1fe   :  { %2436 = vmatprep.mubr.bf16.mxu0 %v2008_v45 }
 0x1ff   :  { %2437 = vmatmul.mubr.bf16.vlgmr.msra.gmra.mxu0 %v2007_v46 }
 0x200   :  { %2881 = vmatpush3.bf16.msra.mxu0 %v3328_v11 }
 0x201   :  { %2882 = vmatprep.subr.bf16.mxu0 %v3329_v47 }
 0x204   :  { %2883 = vmatpush3.bf16.msra.mxu0 %v3330_v14 }
 0x205   :  { %2884 = vmatprep.subr.bf16.mxu0 %v3331_v48 }
 0x208   :  { %2885 = vmatpush3.bf16.msra.mxu0 %v3332_v49 }
 0x209   :  { %2886 = vmatprep.subr.bf16.mxu0 %v3333_v50 }
 0x20c   :  { %2887 = vmatpush3.bf16.msra.mxu0 %v3334_v51 }
 0x20d   :  { %2888 = vmatprep.subr.bf16.mxu0 %v3335_v52 }
 0x210   :  { %2889 = vmatpush3.bf16.msra.mxu0 %v3336_v53 }
 0x211   :  { %2890 = vmatprep.subr.bf16.mxu0 %v3337_v54 }
 0x214   :  { %2891 = vmatpush3.bf16.msra.mxu0 %v3338_v55 }
 0x215   :  { %2892 = vmatprep.subr.bf16.mxu0 %v3339_v56 }
 0x218   :  { %2893 = vmatpush3.bf16.msra.mxu0 %v3340_v57 }
 0x219   :  { %2894 = vmatprep.subr.bf16.mxu0 %v3341_v58 }
 0x21c   :  { %2895 = vmatpush3.bf16.msra.mxu0 %v3342_v59 }
 0x233   :  { %v1871_v37 = vpop.f32.mrf.mxu0  ;;  %v1912_v62 = vpop.f32.mrf.mxu1 }
 0x234   :  { %v1872_v38 = vadd.f32 %v1871_v37, %v776_v60 }
 0x235   :  { %v1873_v63 = vpop.f32.mrf.mxu0  ;;  %v1914_v0 = vpop.f32.mrf.mxu1 }
 0x236   :  { %v1913_v1 = vadd.f32 %v1912_v62, %v1872_v38  ;;  %v1874_v41 = vadd.f32 %v1873_v63, %v780_v61 }
 0x237   :  { %v1875_v34 = vpop.f32.mrf.mxu0  ;;  %v1916_v2 = vpop.f32.mrf.mxu1 }
 0x238   :  { %v1915_v3 = vadd.f32 %v1914_v0, %v1874_v41  ;;  %v2003_v4 = vmax.f32 %v1913_v1, 0.0 }
 0x239   :  { %v1876_v5 = vpop.f32.mrf.mxu0  ;;  %v1917_v6 = vpop.f32.mrf.mxu1 }
 0x23a   :  { %v2004_v7 = vmax.f32 %v1915_v3, 0.0  ;;  %v2009_v12 = vpack.c.bf16 %v2003_v4, %v2003_v4 }
 0x23c   :  { %v2010_v8 = vpack.c.bf16 %v2004_v7, %v2004_v7 }
 0x23e   :  { %2476 = vmatprep.mubr.bf16.mxu1 %v2010_v8 }
 0x23f   :  { %2477 = vmatmul.mubr.bf16.vlgmr.msra.gmra.mxu1 %v2009_v12 }
 0x273   :  { %v1953_v17 = vpop.f32.mrf.mxu0 }
 0x274   :  { %v1954_v18 = vadd.f32 %v1953_v17, %v784_v13  ;;  %v1994_v19 = vpop.f32.mrf.mxu1 }
 0x275   :  { %v1955_v20 = vpop.f32.mrf.mxu0 }
 0x276   :  { %v1995_v21 = vadd.f32 %v1994_v19, %v1954_v18  ;;  %v1956_v22 = vadd.f32 %v1955_v20, %v788_v16  ;;  %v1996_v23 = vpop.f32.mrf.mxu1 }
 0x277   :  { %v1957_v25 = vpop.f32.mrf.mxu0 }
 0x278   :  { %v1997_v26 = vadd.f32 %v1996_v23, %v1956_v22  ;;  %v1998_v27 = vpop.f32.mrf.mxu1  ;;  %v2005_v28 = vmax.f32 %v1995_v21, 0.0 }
 0x279   :  { %v1958_v29 = vpop.f32.mrf.mxu0 }
 0x27a   :  { %v2006_v30 = vmax.f32 %v1997_v26, 0.0  ;;  %v1999_v31 = vpop.f32.mrf.mxu1  ;;  %v2011_v10 = vpack.c.bf16 %v2005_v28, %v2005_v28 }
 0x27c   :  { %v2012_v32 = vpack.c.bf16 %v2006_v30, %v2006_v30 }
 0x27e   :  { %2516 = vmatprep.mubr.bf16.mxu0 %v2012_v32 }
 0x27f   :  { %2517 = vmatmul.mubr.bf16.vlgmr.msra.gmra.mxu0 %v2011_v10 }
 0x2bf   :  { %v2852_v33 = vpop.f32.mrf.mxu0 }
 0x2c1   :  { %v2853_v24 = vpop.f32.mrf.mxu0 }
 0x2c2   :  { %v2854_v35 = vadd.f32 %v2853_v24, %v2852_v33 }
 0x2c3   :  { %v2855_v36 = vpop.f32.mrf.mxu0 }
 0x2c4   :  { %v2439_v44 = vadd.f32 %v2854_v35, %v2787_v40 }
 0x2c5   :  { %v2856_v39 = vpop.f32.mrf.mxu0 }
 0x2ff   :  { %v2874_v42 = vpop.f32.mrf.mxu1 }
 0x301   :  { %v2875_v43 = vpop.f32.mrf.mxu1 }
 0x302   :  { %v2876_v45 = vadd.f32 %v2875_v43, %v2874_v42 }
 0x303   :  { %v2877_v11 = vpop.f32.mrf.mxu1 }
 0x304   :  { %v2479_v46 = vadd.f32 %v2876_v45, %v2439_v44 }
 0x305   :  { %v2878_v47 = vpop.f32.mrf.mxu1 }
 0x33f   :  { %v2896_v14 = vpop.f32.mrf.mxu0 }
 0x341   :  { %v2897_v48 = vpop.f32.mrf.mxu0 }
 0x342   :  { %v2898_v49 = vadd.f32 %v2897_v48, %v2896_v14 }
 0x343   :  { %v2899_v50 = vpop.f32.mrf.mxu0 }
 0x344   :  { %v2519_v51 = vadd.f32 %v2898_v49, %v2479_v46 }
 0x345   :  { %v2900_v52 = vpop.f32.mrf.mxu0 }
 0x346   :  { %2524 = vst [vmem:[%s3539_s7] sm:$0xff] %v2519_v51 }
 0x347   :  { %2529 = vsyncpa [#allocation3], 1 }
 0x348   :  { %2530 = vsyncpa [#allocation5], 1 }

</bundles_post_ra>
